<compile_context>
chip_gen: v6e
topology: v6e:2x2x1
jax: 0.10.0
libtpu: 0.0.40
codegen_flags: <defaults>
</compile_context>

<pallas_src>
import math

import numpy as np
import jax
import jax.numpy as jnp
from jax.experimental import pallas as pl
from jax.experimental.pallas import tpu as pltpu

NUM_CLASSES = 10      # CONFIG['num_classes']
NEG_SLOPE = 0.1       # negative_slope of every LeakyReLU


# --------------------------------------------------------------------------
# Deterministic parameter initialization (HWIO conv weights, 1-D biases)
# --------------------------------------------------------------------------
def _conv3x3_init(key, C):
    kw, kb = jax.random.split(key)
    w = jax.random.normal(kw, (3, 3, C, C), jnp.float32) / math.sqrt(9 * C)
    b = 0.05 * jax.random.normal(kb, (C,), jnp.float32)
    return w, b


def _bn_init(key, C):
    k1, k2, k3, k4 = jax.random.split(key, 4)
    gamma = 1.0 + 0.1 * jax.random.normal(k1, (C,), jnp.float32)
    beta = 0.1 * jax.random.normal(k2, (C,), jnp.float32)
    mean = 0.1 * jax.random.normal(k3, (C,), jnp.float32)
    var = 1.0 + 0.1 * jax.random.uniform(k4, (C,), jnp.float32)
    scale = gamma * jax.lax.rsqrt(var + 1e-5)
    shift = beta - mean * scale
    return scale, shift


def init_residual_block(key, C):
    k = jax.random.split(key, 4)
    p = {}
    p['w1'], p['b1'] = _conv3x3_init(k[0], C)
    p['s1'], p['h1'] = _bn_init(k[1], C)
    p['w2'], p['b2'] = _conv3x3_init(k[2], C)
    p['s2'], p['h2'] = _bn_init(k[3], C)
    return p


def init_conv_block(key, C):
    k = jax.random.split(key, 6)
    p = {}
    p['w1x1'] = jax.random.normal(k[0], (C, C), jnp.float32) / math.sqrt(C)
    p['b1x1'] = 0.05 * jax.random.normal(k[1], (C,), jnp.float32)
    p['w2'], p['b2'] = _conv3x3_init(k[2], C)
    p['s2'], p['h2'] = _bn_init(k[3], C)
    p['w3'], p['b3'] = _conv3x3_init(k[4], C)
    p['s3'], p['h3'] = _bn_init(k[5], C)
    return p


def init_net_params(key, C, H, W):
    keys = jax.random.split(key, 6)
    p = {}
    p['conv0_w'], p['conv0_b'] = _conv3x3_init(keys[0], C)
    p['conv0_scale'], p['conv0_shift'] = _bn_init(keys[1], C)
    p['rb'] = init_residual_block(keys[2], C)    # shared: residual_blocks = [rb] * 2
    p['cb'] = init_conv_block(keys[3], C)        # shared: conv_continue_residual[0] and [2]
    p['rb2'] = init_residual_block(keys[4], C)   # shared: conv_continue_residual[1] and [3]
    Hc, Wc = H - 2, W - 2
    Ph, Pw = Hc // 3, Wc // 3
    F = C * Ph * Pw
    kw, kb = jax.random.split(keys[5])
    p['lin_w'] = jax.random.normal(kw, (F, NUM_CLASSES), jnp.float32) / math.sqrt(F)
    p['lin_b'] = 0.05 * jax.random.normal(kb, (NUM_CLASSES,), jnp.float32)
    return p


# --------------------------------------------------------------------------
# Offline weight re-packing (runs ONCE per parameter set, on the host)
#
# Activation layout:  A[h, (n*W + w)*C + c]   with R = H rows, L = N*W*C lanes.
# The zero border (h,w in {0, last}) is built into the layout.
# --------------------------------------------------------------------------
def build_operands(p, N, C, H, W):
    Hc, Wc = H - 2, W - 2          # feature-map size produced by conv0
    Hp, Wp = Hc + 2, Wc + 2        # padded layout (== H, W)
    R, L = Hp, N * Wp * C
    Ph, Pw = Hc // 3, Wc // 3
    K = NUM_CLASSES
    NK = N * K

    def lane(n, w, c=0):
        return (n * Wp + w) * C + c

    # Interior mask: 1 on interior rows/cols of every image, 0 on the zero border.
    mask = np.zeros((R, L), np.float32)
    for n in range(N):
        for w in range(1, Wc + 1):
            mask[1:Hc + 1, lane(n, w):lane(n, w) + C] = 1.0

    def banded_conv(w_hwio, bn_scale):
        """(3,3,C,C) HWIO weight (BN scale folded) -> (3L, L) stacked banded matrix.

        Row block dy expects the activation rolled so that row h holds A[h-1+dy]."""
        ws = (np.asarray(w_hwio, np.float32)
              * np.asarray(bn_scale, np.float32)[None, None, None, :])
        B = np.zeros((3 * L, L), np.float32)
        for dy in range(3):
            for dx in range(3):
                for n in range(N):
                    for wd in range(1, Wc + 1):
                        src = dy * L + lane(n, wd - 1 + dx)
                        dst = lane(n, wd)
                        B[src:src + C, dst:dst + C] = ws[dy, dx]
        return B

    def interior_bias(vec_c):
        """(C,) per-channel vector -> full (R, L) array, zero on the border."""
        r = np.zeros((R, L), np.float32)
        v = np.asarray(vec_c, np.float32)
        for n in range(N):
            for w in range(1, Wc + 1):
                r[1:Hc + 1, lane(n, w):lane(n, w) + C] = v
        return r

    # 7 distinct 3x3 conv layers, ordered as the kernel indexes them.
    conv_layers = [
        (p['conv0_w'], p['conv0_b'], p['conv0_scale'], p['conv0_shift']),   # 0: Net.conv
        (p['rb']['w1'], p['rb']['b1'], p['rb']['s1'], p['rb']['h1']),       # 1
        (p['rb']['w2'], p['rb']['b2'], p['rb']['s2'], p['rb']['h2']),       # 2
        (p['cb']['w2'], p['cb']['b2'], p['cb']['s2'], p['cb']['h2']),       # 3
        (p['cb']['w3'], p['cb']['b3'], p['cb']['s3'], p['cb']['h3']),       # 4
        (p['rb2']['w1'], p['rb2']['b1'], p['rb2']['s1'], p['rb2']['h1']),   # 5
        (p['rb2']['w2'], p['rb2']['b2'], p['rb2']['s2'], p['rb2']['h2']),   # 6
    ]
    B_list, SH_list = [], []
    for w, b, sc, sh in conv_layers:
        B_list.append(banded_conv(w, sc))
        # Fold conv bias into BN shift: scale*(z + b) + shift = scale*z + (scale*b + shift)
        SH_list.append(interior_bias(np.asarray(sc) * np.asarray(b) + np.asarray(sh)))
    B_all = np.stack(B_list)                                       # (7, 3L, L)

    # ConvBlock 1x1 conv: block-diagonal matrix + pre-masked bias (index 7 in SH).
    B1 = np.zeros((L, L), np.float32)
    w1 = np.asarray(p['cb']['w1x1'], np.float32)
    for n in range(N):
        for w in range(1, Wc + 1):
            B1[lane(n, w):lane(n, w) + C, lane(n, w):lane(n, w) + C] = w1
    SH_all = np.stack(SH_list + [interior_bias(p['cb']['b1x1'])])  # (8, R, L)

    # AvgPool2d(3) + Flatten(NCHW) + Linear, pre-composed into 3 matmuls.
    PoolR = np.zeros((Ph, R), np.float32)                          # row pooling (1/3)
    for ph in range(Ph):
        PoolR[ph, 1 + 3 * ph: 1 + 3 * ph + 3] = 1.0 / 3.0

    Wl = np.asarray(p['lin_w'], np.float32)                        # (C*Ph*Pw, K)
    # G folds column pooling (1/3), NCHW flatten and the Linear weight.
    G = np.zeros((L, Ph * NK), np.float32)
    for n in range(N):
        for w in range(1, 3 * Pw + 1):
            pw = (w - 1) // 3
            for c in range(C):
                src = lane(n, w, c)
                for ph in range(Ph):
                    G[src, ph * NK + n * K: ph * NK + (n + 1) * K] = (
                        (1.0 / 3.0) * Wl[c * Ph * Pw + ph * Pw + pw, :])
    D = np.zeros((Ph, Ph * NK), np.float32)                        # diagonal selector
    for ph in range(Ph):
        D[ph, ph * NK:(ph + 1) * NK] = 1.0
    Fsum = np.zeros((Ph * NK, NK), np.float32)                     # collapse ph blocks
    for ph in range(Ph):
        Fsum[ph * NK:(ph + 1) * NK, :] = np.eye(NK, dtype=np.float32)
    bl = np.tile(np.asarray(p['lin_b'], np.float32).reshape(1, K), (1, N))  # (1, NK)

    return dict(
        B=jnp.asarray(B_all, jnp.bfloat16),       # bf16 MXU operands (f32 accumulate)
        B1=jnp.asarray(B1, jnp.float32),
        SH=jnp.asarray(SH_all, jnp.float32),
        mask=jnp.asarray(mask, jnp.float32),
        PoolR=jnp.asarray(PoolR, jnp.float32),
        G=jnp.asarray(G, jnp.float32),
        D=jnp.asarray(D, jnp.float32),
        Fsum=jnp.asarray(Fsum, jnp.float32),
        bl=jnp.asarray(bl, jnp.float32),
    )


# --------------------------------------------------------------------------
# The single fused Pallas kernel (whole network, whole batch, gridless)
# --------------------------------------------------------------------------
def _make_net_kernel(N, C, H, W):
    R, L = H, N * W * C
    SH_1X1 = 7      # index of the 1x1-conv bias in the SH stack

    def kernel(x_ref, b_ref, b1_ref, sh_ref, mask_ref,
               poolr_ref, g_ref, d_ref, fsum_ref, bl_ref, out_ref):
        mask = mask_ref[...]

        def leaky(z):
            return jnp.where(z >= 0, z, z * NEG_SLOPE)

        def conv3x3_bn(a, layer, act):
            # Vertical taps via XLU rolls (jnp.roll semantics: out[h] = in[h - shift]).
            # Wrap-around rows land on border rows, which `* mask` zeroes below.
            a_up = pltpu.roll(a, shift=1, axis=0)        # a_up[h] = a[h-1]
            a_dn = pltpu.roll(a, shift=R - 1, axis=0)    # a_dn[h] = a[h+1]
            # Wide-K fusion: one MXU dot per conv, K = 3L.
            a_cat = jnp.concatenate([a_up, a, a_dn], axis=1).astype(jnp.bfloat16)
            z = jnp.dot(a_cat, b_ref[layer], preferred_element_type=jnp.float32)
            z = z * mask + sh_ref[layer]      # bias+BN shift is pre-masked (zero border)
            if act:
                z = leaky(z)
            return z

        def residual_block(a, l1, l2):
            y = conv3x3_bn(a, l1, act=True)
            y = conv3x3_bn(y, l2, act=False)
            return leaky(a + y)               # borders stay zero: no extra mask needed

        def conv_block(a):
            road1 = conv3x3_bn(a, 3, act=False)           # conv_2: conv + BN
            road1 = conv3x3_bn(road1, 4, act=True)        # conv_3: conv + BN + LeakyReLU
            road2 = jnp.dot(a, b1_ref[...],
                            preferred_element_type=jnp.float32) + sh_ref[SH_1X1]
            return leaky(road1 + road2)

        # Net.conv: valid 3x3 + BN + LeakyReLU (writes into the padded layout).
        y = conv3x3_bn(x_ref[...], 0, act=True)
        # residual_blocks = [ResidualBlock] * 2 (same instance, shared weights).
        for _ in range(2):
            y = residual_block(y, 1, 2)
        # conv_continue_residual = [ConvBlock, ResidualBlock] * 2 (shared instances).
        for _ in range(2):
            y = conv_block(y)
            y = residual_block(y, 5, 6)

        # AvgPool2d(3) + Flatten(NCHW) + Linear: 3 small matmuls + one XLU row-sum.
        p1 = jnp.dot(poolr_ref[...], y, preferred_element_type=jnp.float32)   # (Ph, L)
        u = jnp.dot(p1, g_ref[...], preferred_element_type=jnp.float32)       # (Ph, Ph*N*K)
        s = jnp.sum(u * d_ref[...], axis=0, keepdims=True)                    # (1, Ph*N*K)
        out_ref[...] = (jnp.dot(s, fsum_ref[...], preferred_element_type=jnp.float32)
                        + bl_ref[...])                                         # (1, N*K)

    return kernel


# --------------------------------------------------------------------------
# Wrapper: pack operands once, jit the forward path
# --------------------------------------------------------------------------
def make_net_forward(params, N, C, H, W):
    ops = build_operands(params, N, C, H, W)              # hoisted: runs once
    Hc = H - 2
    Ph = Hc // 3
    R, L = H, N * W * C
    NK = N * NUM_CLASSES

    operands = (ops['B'], ops['B1'], ops['SH'], ops['mask'], ops['PoolR'],
                ops['G'], ops['D'], ops['Fsum'], ops['bl'])

    def _nbytes(a):
        return int(a.size) * a.dtype.itemsize

    flops = (13 * 2 * R * (3 * L) * L          # fused 3x3 conv dots
             + 2 * 2 * R * L * L               # 1x1 conv dots (ConvBlock x2)
             + 2 * Ph * R * L                  # row pooling
             + 2 * Ph * L * (Ph * NK)          # pooled @ G
             + 2 * (Ph * NK) * NK)             # diagonal collapse
    bytes_accessed = (R * L * 4 + sum(_nbytes(o) for o in operands) + NK * 4)

    vmem = pltpu.MemorySpace.VMEM
    fused = pl.pallas_call(
        _make_net_kernel(N, C, H, W),
        out_shape=jax.ShapeDtypeStruct((1, NK), jnp.float32),
        in_specs=[pl.BlockSpec(memory_space=vmem)] * (1 + len(operands)),
        out_specs=pl.BlockSpec(memory_space=vmem),
        cost_estimate=pl.CostEstimate(flops=int(flops), transcendentals=0,
                                      bytes_accessed=int(bytes_accessed)),
        compiler_params=pltpu.CompilerParams(vmem_limit_bytes=32 * 1024 * 1024),
    )

    @jax.jit
    def forward(x_nchw, *consts):
        # NCHW -> 128-lane layout: row = h, lane = (n*W + w)*C + c.
        x2d = jnp.transpose(x_nchw.astype(jnp.float32), (2, 0, 3, 1)).reshape(R, L)
        flat = fused(x2d, *consts)                         # (1, N*K)
        return flat.reshape(N, NUM_CLASSES)

    return lambda x: forward(x, *operands)


# --------------------------------------------------------------------------
if __name__ == "__main__":
    key = jax.random.PRNGKey(0)
    kx, kp = jax.random.split(key)

    N, C, H, W = 2, 4, 16, 16          # NCHW, like the PyTorch reference
    x = jax.random.normal(kx, (N, C, H, W), jnp.float32)
    params = init_net_params(kp, C, H, W)

    net_forward = make_net_forward(params, N, C, H, W)     # operand packing hoisted here
    out = net_forward(x)
    out = jax.block_until_ready(out)
    out = jax.block_until_ready(net_forward(x))            # second call: no host repacking

    assert out.shape == (N, NUM_CLASSES), out.shape
    assert bool(jnp.all(jnp.isfinite(out)))
    print("KERNEL_OK")
</pallas_src>

<mosaic_0001>
module attributes {stable_mosaic.version = 11 : i64} {
  func.func @kernel(%arg0: memref<16x128xf32, #tpu.memory_space<vmem>>, %arg1: memref<7x384x128xbf16, #tpu.memory_space<vmem>>, %arg2: memref<128x128xf32, #tpu.memory_space<vmem>>, %arg3: memref<8x16x128xf32, #tpu.memory_space<vmem>>, %arg4: memref<16x128xf32, #tpu.memory_space<vmem>>, %arg5: memref<4x16xf32, #tpu.memory_space<vmem>>, %arg6: memref<128x80xf32, #tpu.memory_space<vmem>>, %arg7: memref<4x80xf32, #tpu.memory_space<vmem>>, %arg8: memref<80x20xf32, #tpu.memory_space<vmem>>, %arg9: memref<1x20xf32, #tpu.memory_space<vmem>>, %arg10: memref<1x20xf32, #tpu.memory_space<vmem>>) attributes {dimension_semantics = [], scalar_prefetch = 0 : i64, scratch_operands = 0 : i64, tpu.core_type = #tpu.core_type<tc>} {
    %c0 = arith.constant 0 : index
    %c0_0 = arith.constant 0 : index
    %0 = vector.load %arg4[%c0, %c0_0] : memref<16x128xf32, #tpu.memory_space<vmem>>, vector<16x128xf32>
    %c0_1 = arith.constant 0 : index
    %c0_2 = arith.constant 0 : index
    %1 = vector.load %arg0[%c0_1, %c0_2] : memref<16x128xf32, #tpu.memory_space<vmem>>, vector<16x128xf32>
    %c1_i32 = arith.constant 1 : i32
    %2 = tpu.dynamic_rotate %1 by %c1_i32 dim 0 : vector<16x128xf32>, i32 -> vector<16x128xf32>
    %c15_i32 = arith.constant 15 : i32
    %3 = tpu.dynamic_rotate %1 by %c15_i32 dim 0 : vector<16x128xf32>, i32 -> vector<16x128xf32>
    %4 = tpu.concatenate %2, %1, %3 in 1 : vector<16x128xf32>, vector<16x128xf32>, vector<16x128xf32> -> vector<16x384xf32>
    %5 = arith.truncf %4 : vector<16x384xf32> to vector<16x384xbf16>
    %c0_3 = arith.constant 0 : index
    %c0_4 = arith.constant 0 : index
    %c0_5 = arith.constant 0 : index
    %6 = vector.load %arg1[%c0_3, %c0_4, %c0_5] : memref<7x384x128xbf16, #tpu.memory_space<vmem>>, vector<1x384x128xbf16>
    %7 = vector.shape_cast %6 : vector<1x384x128xbf16> to vector<384x128xbf16>
    %cst = arith.constant dense<0.000000e+00> : vector<16x128xf32>
    %8 = tpu.matmul %5, %7, %cst {dimension_numbers = #tpu.dot_dimension_numbers<[1], [0], [0], [1], [0, 0, 1, 1], [], []>} : vector<16x384xbf16>, vector<384x128xbf16>, vector<16x128xf32> -> vector<16x128xf32>
    %9 = arith.mulf %8, %0 : vector<16x128xf32>
    %c0_6 = arith.constant 0 : index
    %c0_7 = arith.constant 0 : index
    %c0_8 = arith.constant 0 : index
    %10 = vector.load %arg3[%c0_6, %c0_7, %c0_8] : memref<8x16x128xf32, #tpu.memory_space<vmem>>, vector<1x16x128xf32>
    %11 = vector.shape_cast %10 : vector<1x16x128xf32> to vector<16x128xf32>
    %12 = arith.addf %9, %11 : vector<16x128xf32>
    %cst_9 = arith.constant 0.000000e+00 : f32
    %13 = vector.broadcast %cst_9 : f32 to vector<16x128xf32>
    %14 = arith.cmpf oge, %12, %13 : vector<16x128xf32>
    %cst_10 = arith.constant 1.000000e-01 : f32
    %15 = vector.broadcast %cst_10 : f32 to vector<16x128xf32>
    %16 = arith.mulf %12, %15 : vector<16x128xf32>
    %17 = arith.select %14, %12, %16 : vector<16x128xi1>, vector<16x128xf32>
    %c1_i32_11 = arith.constant 1 : i32
    %18 = tpu.dynamic_rotate %17 by %c1_i32_11 dim 0 : vector<16x128xf32>, i32 -> vector<16x128xf32>
    %c15_i32_12 = arith.constant 15 : i32
    %19 = tpu.dynamic_rotate %17 by %c15_i32_12 dim 0 : vector<16x128xf32>, i32 -> vector<16x128xf32>
    %20 = tpu.concatenate %18, %17, %19 in 1 : vector<16x128xf32>, vector<16x128xf32>, vector<16x128xf32> -> vector<16x384xf32>
    %21 = arith.truncf %20 : vector<16x384xf32> to vector<16x384xbf16>
    %c1 = arith.constant 1 : index
    %c0_13 = arith.constant 0 : index
    %c0_14 = arith.constant 0 : index
    %22 = vector.load %arg1[%c1, %c0_13, %c0_14] : memref<7x384x128xbf16, #tpu.memory_space<vmem>>, vector<1x384x128xbf16>
    %23 = vector.shape_cast %22 : vector<1x384x128xbf16> to vector<384x128xbf16>
    %cst_15 = arith.constant dense<0.000000e+00> : vector<16x128xf32>
    %24 = tpu.matmul %21, %23, %cst_15 {dimension_numbers = #tpu.dot_dimension_numbers<[1], [0], [0], [1], [0, 0, 1, 1], [], []>} : vector<16x384xbf16>, vector<384x128xbf16>, vector<16x128xf32> -> vector<16x128xf32>
    %25 = arith.mulf %24, %0 : vector<16x128xf32>
    %c1_16 = arith.constant 1 : index
    %c0_17 = arith.constant 0 : index
    %c0_18 = arith.constant 0 : index
    %26 = vector.load %arg3[%c1_16, %c0_17, %c0_18] : memref<8x16x128xf32, #tpu.memory_space<vmem>>, vector<1x16x128xf32>
    %27 = vector.shape_cast %26 : vector<1x16x128xf32> to vector<16x128xf32>
    %28 = arith.addf %25, %27 : vector<16x128xf32>
    %cst_19 = arith.constant 0.000000e+00 : f32
    %29 = vector.broadcast %cst_19 : f32 to vector<16x128xf32>
    %30 = arith.cmpf oge, %28, %29 : vector<16x128xf32>
    %cst_20 = arith.constant 1.000000e-01 : f32
    %31 = vector.broadcast %cst_20 : f32 to vector<16x128xf32>
    %32 = arith.mulf %28, %31 : vector<16x128xf32>
    %33 = arith.select %30, %28, %32 : vector<16x128xi1>, vector<16x128xf32>
    %c1_i32_21 = arith.constant 1 : i32
    %34 = tpu.dynamic_rotate %33 by %c1_i32_21 dim 0 : vector<16x128xf32>, i32 -> vector<16x128xf32>
    %c15_i32_22 = arith.constant 15 : i32
    %35 = tpu.dynamic_rotate %33 by %c15_i32_22 dim 0 : vector<16x128xf32>, i32 -> vector<16x128xf32>
    %36 = tpu.concatenate %34, %33, %35 in 1 : vector<16x128xf32>, vector<16x128xf32>, vector<16x128xf32> -> vector<16x384xf32>
    %37 = arith.truncf %36 : vector<16x384xf32> to vector<16x384xbf16>
    %c2 = arith.constant 2 : index
    %c0_23 = arith.constant 0 : index
    %c0_24 = arith.constant 0 : index
    %38 = vector.load %arg1[%c2, %c0_23, %c0_24] : memref<7x384x128xbf16, #tpu.memory_space<vmem>>, vector<1x384x128xbf16>
    %39 = vector.shape_cast %38 : vector<1x384x128xbf16> to vector<384x128xbf16>
    %cst_25 = arith.constant dense<0.000000e+00> : vector<16x128xf32>
    %40 = tpu.matmul %37, %39, %cst_25 {dimension_numbers = #tpu.dot_dimension_numbers<[1], [0], [0], [1], [0, 0, 1, 1], [], []>} : vector<16x384xbf16>, vector<384x128xbf16>, vector<16x128xf32> -> vector<16x128xf32>
    %41 = arith.mulf %40, %0 : vector<16x128xf32>
    %c2_26 = arith.constant 2 : index
    %c0_27 = arith.constant 0 : index
    %c0_28 = arith.constant 0 : index
    %42 = vector.load %arg3[%c2_26, %c0_27, %c0_28] : memref<8x16x128xf32, #tpu.memory_space<vmem>>, vector<1x16x128xf32>
    %43 = vector.shape_cast %42 : vector<1x16x128xf32> to vector<16x128xf32>
    %44 = arith.addf %41, %43 : vector<16x128xf32>
    %45 = arith.addf %17, %44 : vector<16x128xf32>
    %cst_29 = arith.constant 0.000000e+00 : f32
    %46 = vector.broadcast %cst_29 : f32 to vector<16x128xf32>
    %47 = arith.cmpf oge, %45, %46 : vector<16x128xf32>
    %cst_30 = arith.constant 1.000000e-01 : f32
    %48 = vector.broadcast %cst_30 : f32 to vector<16x128xf32>
    %49 = arith.mulf %45, %48 : vector<16x128xf32>
    %50 = arith.select %47, %45, %49 : vector<16x128xi1>, vector<16x128xf32>
    %c1_i32_31 = arith.constant 1 : i32
    %51 = tpu.dynamic_rotate %50 by %c1_i32_31 dim 0 : vector<16x128xf32>, i32 -> vector<16x128xf32>
    %c15_i32_32 = arith.constant 15 : i32
    %52 = tpu.dynamic_rotate %50 by %c15_i32_32 dim 0 : vector<16x128xf32>, i32 -> vector<16x128xf32>
    %53 = tpu.concatenate %51, %50, %52 in 1 : vector<16x128xf32>, vector<16x128xf32>, vector<16x128xf32> -> vector<16x384xf32>
    %54 = arith.truncf %53 : vector<16x384xf32> to vector<16x384xbf16>
    %c1_33 = arith.constant 1 : index
    %c0_34 = arith.constant 0 : index
    %c0_35 = arith.constant 0 : index
    %55 = vector.load %arg1[%c1_33, %c0_34, %c0_35] : memref<7x384x128xbf16, #tpu.memory_space<vmem>>, vector<1x384x128xbf16>
    %56 = vector.shape_cast %55 : vector<1x384x128xbf16> to vector<384x128xbf16>
    %cst_36 = arith.constant dense<0.000000e+00> : vector<16x128xf32>
    %57 = tpu.matmul %54, %56, %cst_36 {dimension_numbers = #tpu.dot_dimension_numbers<[1], [0], [0], [1], [0, 0, 1, 1], [], []>} : vector<16x384xbf16>, vector<384x128xbf16>, vector<16x128xf32> -> vector<16x128xf32>
    %58 = arith.mulf %57, %0 : vector<16x128xf32>
    %c1_37 = arith.constant 1 : index
    %c0_38 = arith.constant 0 : index
    %c0_39 = arith.constant 0 : index
    %59 = vector.load %arg3[%c1_37, %c0_38, %c0_39] : memref<8x16x128xf32, #tpu.memory_space<vmem>>, vector<1x16x128xf32>
    %60 = vector.shape_cast %59 : vector<1x16x128xf32> to vector<16x128xf32>
    %61 = arith.addf %58, %60 : vector<16x128xf32>
    %cst_40 = arith.constant 0.000000e+00 : f32
    %62 = vector.broadcast %cst_40 : f32 to vector<16x128xf32>
    %63 = arith.cmpf oge, %61, %62 : vector<16x128xf32>
    %cst_41 = arith.constant 1.000000e-01 : f32
    %64 = vector.broadcast %cst_41 : f32 to vector<16x128xf32>
    %65 = arith.mulf %61, %64 : vector<16x128xf32>
    %66 = arith.select %63, %61, %65 : vector<16x128xi1>, vector<16x128xf32>
    %c1_i32_42 = arith.constant 1 : i32
    %67 = tpu.dynamic_rotate %66 by %c1_i32_42 dim 0 : vector<16x128xf32>, i32 -> vector<16x128xf32>
    %c15_i32_43 = arith.constant 15 : i32
    %68 = tpu.dynamic_rotate %66 by %c15_i32_43 dim 0 : vector<16x128xf32>, i32 -> vector<16x128xf32>
    %69 = tpu.concatenate %67, %66, %68 in 1 : vector<16x128xf32>, vector<16x128xf32>, vector<16x128xf32> -> vector<16x384xf32>
    %70 = arith.truncf %69 : vector<16x384xf32> to vector<16x384xbf16>
    %c2_44 = arith.constant 2 : index
    %c0_45 = arith.constant 0 : index
    %c0_46 = arith.constant 0 : index
    %71 = vector.load %arg1[%c2_44, %c0_45, %c0_46] : memref<7x384x128xbf16, #tpu.memory_space<vmem>>, vector<1x384x128xbf16>
    %72 = vector.shape_cast %71 : vector<1x384x128xbf16> to vector<384x128xbf16>
    %cst_47 = arith.constant dense<0.000000e+00> : vector<16x128xf32>
    %73 = tpu.matmul %70, %72, %cst_47 {dimension_numbers = #tpu.dot_dimension_numbers<[1], [0], [0], [1], [0, 0, 1, 1], [], []>} : vector<16x384xbf16>, vector<384x128xbf16>, vector<16x128xf32> -> vector<16x128xf32>
    %74 = arith.mulf %73, %0 : vector<16x128xf32>
    %c2_48 = arith.constant 2 : index
    %c0_49 = arith.constant 0 : index
    %c0_50 = arith.constant 0 : index
    %75 = vector.load %arg3[%c2_48, %c0_49, %c0_50] : memref<8x16x128xf32, #tpu.memory_space<vmem>>, vector<1x16x128xf32>
    %76 = vector.shape_cast %75 : vector<1x16x128xf32> to vector<16x128xf32>
    %77 = arith.addf %74, %76 : vector<16x128xf32>
    %78 = arith.addf %50, %77 : vector<16x128xf32>
    %cst_51 = arith.constant 0.000000e+00 : f32
    %79 = vector.broadcast %cst_51 : f32 to vector<16x128xf32>
    %80 = arith.cmpf oge, %78, %79 : vector<16x128xf32>
    %cst_52 = arith.constant 1.000000e-01 : f32
    %81 = vector.broadcast %cst_52 : f32 to vector<16x128xf32>
    %82 = arith.mulf %78, %81 : vector<16x128xf32>
    %83 = arith.select %80, %78, %82 : vector<16x128xi1>, vector<16x128xf32>
    %c1_i32_53 = arith.constant 1 : i32
    %84 = tpu.dynamic_rotate %83 by %c1_i32_53 dim 0 : vector<16x128xf32>, i32 -> vector<16x128xf32>
    %c15_i32_54 = arith.constant 15 : i32
    %85 = tpu.dynamic_rotate %83 by %c15_i32_54 dim 0 : vector<16x128xf32>, i32 -> vector<16x128xf32>
    %86 = tpu.concatenate %84, %83, %85 in 1 : vector<16x128xf32>, vector<16x128xf32>, vector<16x128xf32> -> vector<16x384xf32>
    %87 = arith.truncf %86 : vector<16x384xf32> to vector<16x384xbf16>
    %c3 = arith.constant 3 : index
    %c0_55 = arith.constant 0 : index
    %c0_56 = arith.constant 0 : index
    %88 = vector.load %arg1[%c3, %c0_55, %c0_56] : memref<7x384x128xbf16, #tpu.memory_space<vmem>>, vector<1x384x128xbf16>
    %89 = vector.shape_cast %88 : vector<1x384x128xbf16> to vector<384x128xbf16>
    %cst_57 = arith.constant dense<0.000000e+00> : vector<16x128xf32>
    %90 = tpu.matmul %87, %89, %cst_57 {dimension_numbers = #tpu.dot_dimension_numbers<[1], [0], [0], [1], [0, 0, 1, 1], [], []>} : vector<16x384xbf16>, vector<384x128xbf16>, vector<16x128xf32> -> vector<16x128xf32>
    %91 = arith.mulf %90, %0 : vector<16x128xf32>
    %c3_58 = arith.constant 3 : index
    %c0_59 = arith.constant 0 : index
    %c0_60 = arith.constant 0 : index
    %92 = vector.load %arg3[%c3_58, %c0_59, %c0_60] : memref<8x16x128xf32, #tpu.memory_space<vmem>>, vector<1x16x128xf32>
    %93 = vector.shape_cast %92 : vector<1x16x128xf32> to vector<16x128xf32>
    %94 = arith.addf %91, %93 : vector<16x128xf32>
    %c1_i32_61 = arith.constant 1 : i32
    %95 = tpu.dynamic_rotate %94 by %c1_i32_61 dim 0 : vector<16x128xf32>, i32 -> vector<16x128xf32>
    %c15_i32_62 = arith.constant 15 : i32
    %96 = tpu.dynamic_rotate %94 by %c15_i32_62 dim 0 : vector<16x128xf32>, i32 -> vector<16x128xf32>
    %97 = tpu.concatenate %95, %94, %96 in 1 : vector<16x128xf32>, vector<16x128xf32>, vector<16x128xf32> -> vector<16x384xf32>
    %98 = arith.truncf %97 : vector<16x384xf32> to vector<16x384xbf16>
    %c4 = arith.constant 4 : index
    %c0_63 = arith.constant 0 : index
    %c0_64 = arith.constant 0 : index
    %99 = vector.load %arg1[%c4, %c0_63, %c0_64] : memref<7x384x128xbf16, #tpu.memory_space<vmem>>, vector<1x384x128xbf16>
    %100 = vector.shape_cast %99 : vector<1x384x128xbf16> to vector<384x128xbf16>
    %cst_65 = arith.constant dense<0.000000e+00> : vector<16x128xf32>
    %101 = tpu.matmul %98, %100, %cst_65 {dimension_numbers = #tpu.dot_dimension_numbers<[1], [0], [0], [1], [0, 0, 1, 1], [], []>} : vector<16x384xbf16>, vector<384x128xbf16>, vector<16x128xf32> -> vector<16x128xf32>
    %102 = arith.mulf %101, %0 : vector<16x128xf32>
    %c4_66 = arith.constant 4 : index
    %c0_67 = arith.constant 0 : index
    %c0_68 = arith.constant 0 : index
    %103 = vector.load %arg3[%c4_66, %c0_67, %c0_68] : memref<8x16x128xf32, #tpu.memory_space<vmem>>, vector<1x16x128xf32>
    %104 = vector.shape_cast %103 : vector<1x16x128xf32> to vector<16x128xf32>
    %105 = arith.addf %102, %104 : vector<16x128xf32>
    %cst_69 = arith.constant 0.000000e+00 : f32
    %106 = vector.broadcast %cst_69 : f32 to vector<16x128xf32>
    %107 = arith.cmpf oge, %105, %106 : vector<16x128xf32>
    %cst_70 = arith.constant 1.000000e-01 : f32
    %108 = vector.broadcast %cst_70 : f32 to vector<16x128xf32>
    %109 = arith.mulf %105, %108 : vector<16x128xf32>
    %110 = arith.select %107, %105, %109 : vector<16x128xi1>, vector<16x128xf32>
    %c0_71 = arith.constant 0 : index
    %c0_72 = arith.constant 0 : index
    %111 = vector.load %arg2[%c0_71, %c0_72] : memref<128x128xf32, #tpu.memory_space<vmem>>, vector<128x128xf32>
    %cst_73 = arith.constant dense<0.000000e+00> : vector<16x128xf32>
    %112 = tpu.matmul %83, %111, %cst_73 {dimension_numbers = #tpu.dot_dimension_numbers<[1], [0], [0], [1], [0, 0, 1, 1], [], []>} : vector<16x128xf32>, vector<128x128xf32>, vector<16x128xf32> -> vector<16x128xf32>
    %c7 = arith.constant 7 : index
    %c0_74 = arith.constant 0 : index
    %c0_75 = arith.constant 0 : index
    %113 = vector.load %arg3[%c7, %c0_74, %c0_75] : memref<8x16x128xf32, #tpu.memory_space<vmem>>, vector<1x16x128xf32>
    %114 = vector.shape_cast %113 : vector<1x16x128xf32> to vector<16x128xf32>
    %115 = arith.addf %112, %114 : vector<16x128xf32>
    %116 = arith.addf %110, %115 : vector<16x128xf32>
    %cst_76 = arith.constant 0.000000e+00 : f32
    %117 = vector.broadcast %cst_76 : f32 to vector<16x128xf32>
    %118 = arith.cmpf oge, %116, %117 : vector<16x128xf32>
    %cst_77 = arith.constant 1.000000e-01 : f32
    %119 = vector.broadcast %cst_77 : f32 to vector<16x128xf32>
    %120 = arith.mulf %116, %119 : vector<16x128xf32>
    %121 = arith.select %118, %116, %120 : vector<16x128xi1>, vector<16x128xf32>
    %c1_i32_78 = arith.constant 1 : i32
    %122 = tpu.dynamic_rotate %121 by %c1_i32_78 dim 0 : vector<16x128xf32>, i32 -> vector<16x128xf32>
    %c15_i32_79 = arith.constant 15 : i32
    %123 = tpu.dynamic_rotate %121 by %c15_i32_79 dim 0 : vector<16x128xf32>, i32 -> vector<16x128xf32>
    %124 = tpu.concatenate %122, %121, %123 in 1 : vector<16x128xf32>, vector<16x128xf32>, vector<16x128xf32> -> vector<16x384xf32>
    %125 = arith.truncf %124 : vector<16x384xf32> to vector<16x384xbf16>
    %c5 = arith.constant 5 : index
    %c0_80 = arith.constant 0 : index
    %c0_81 = arith.constant 0 : index
    %126 = vector.load %arg1[%c5, %c0_80, %c0_81] : memref<7x384x128xbf16, #tpu.memory_space<vmem>>, vector<1x384x128xbf16>
    %127 = vector.shape_cast %126 : vector<1x384x128xbf16> to vector<384x128xbf16>
    %cst_82 = arith.constant dense<0.000000e+00> : vector<16x128xf32>
    %128 = tpu.matmul %125, %127, %cst_82 {dimension_numbers = #tpu.dot_dimension_numbers<[1], [0], [0], [1], [0, 0, 1, 1], [], []>} : vector<16x384xbf16>, vector<384x128xbf16>, vector<16x128xf32> -> vector<16x128xf32>
    %129 = arith.mulf %128, %0 : vector<16x128xf32>
    %c5_83 = arith.constant 5 : index
    %c0_84 = arith.constant 0 : index
    %c0_85 = arith.constant 0 : index
    %130 = vector.load %arg3[%c5_83, %c0_84, %c0_85] : memref<8x16x128xf32, #tpu.memory_space<vmem>>, vector<1x16x128xf32>
    %131 = vector.shape_cast %130 : vector<1x16x128xf32> to vector<16x128xf32>
    %132 = arith.addf %129, %131 : vector<16x128xf32>
    %cst_86 = arith.constant 0.000000e+00 : f32
    %133 = vector.broadcast %cst_86 : f32 to vector<16x128xf32>
    %134 = arith.cmpf oge, %132, %133 : vector<16x128xf32>
    %cst_87 = arith.constant 1.000000e-01 : f32
    %135 = vector.broadcast %cst_87 : f32 to vector<16x128xf32>
    %136 = arith.mulf %132, %135 : vector<16x128xf32>
    %137 = arith.select %134, %132, %136 : vector<16x128xi1>, vector<16x128xf32>
    %c1_i32_88 = arith.constant 1 : i32
    %138 = tpu.dynamic_rotate %137 by %c1_i32_88 dim 0 : vector<16x128xf32>, i32 -> vector<16x128xf32>
    %c15_i32_89 = arith.constant 15 : i32
    %139 = tpu.dynamic_rotate %137 by %c15_i32_89 dim 0 : vector<16x128xf32>, i32 -> vector<16x128xf32>
    %140 = tpu.concatenate %138, %137, %139 in 1 : vector<16x128xf32>, vector<16x128xf32>, vector<16x128xf32> -> vector<16x384xf32>
    %141 = arith.truncf %140 : vector<16x384xf32> to vector<16x384xbf16>
    %c6 = arith.constant 6 : index
    %c0_90 = arith.constant 0 : index
    %c0_91 = arith.constant 0 : index
    %142 = vector.load %arg1[%c6, %c0_90, %c0_91] : memref<7x384x128xbf16, #tpu.memory_space<vmem>>, vector<1x384x128xbf16>
    %143 = vector.shape_cast %142 : vector<1x384x128xbf16> to vector<384x128xbf16>
    %cst_92 = arith.constant dense<0.000000e+00> : vector<16x128xf32>
    %144 = tpu.matmul %141, %143, %cst_92 {dimension_numbers = #tpu.dot_dimension_numbers<[1], [0], [0], [1], [0, 0, 1, 1], [], []>} : vector<16x384xbf16>, vector<384x128xbf16>, vector<16x128xf32> -> vector<16x128xf32>
    %145 = arith.mulf %144, %0 : vector<16x128xf32>
    %c6_93 = arith.constant 6 : index
    %c0_94 = arith.constant 0 : index
    %c0_95 = arith.constant 0 : index
    %146 = vector.load %arg3[%c6_93, %c0_94, %c0_95] : memref<8x16x128xf32, #tpu.memory_space<vmem>>, vector<1x16x128xf32>
    %147 = vector.shape_cast %146 : vector<1x16x128xf32> to vector<16x128xf32>
    %148 = arith.addf %145, %147 : vector<16x128xf32>
    %149 = arith.addf %121, %148 : vector<16x128xf32>
    %cst_96 = arith.constant 0.000000e+00 : f32
    %150 = vector.broadcast %cst_96 : f32 to vector<16x128xf32>
    %151 = arith.cmpf oge, %149, %150 : vector<16x128xf32>
    %cst_97 = arith.constant 1.000000e-01 : f32
    %152 = vector.broadcast %cst_97 : f32 to vector<16x128xf32>
    %153 = arith.mulf %149, %152 : vector<16x128xf32>
    %154 = arith.select %151, %149, %153 : vector<16x128xi1>, vector<16x128xf32>
    %c1_i32_98 = arith.constant 1 : i32
    %155 = tpu.dynamic_rotate %154 by %c1_i32_98 dim 0 : vector<16x128xf32>, i32 -> vector<16x128xf32>
    %c15_i32_99 = arith.constant 15 : i32
    %156 = tpu.dynamic_rotate %154 by %c15_i32_99 dim 0 : vector<16x128xf32>, i32 -> vector<16x128xf32>
    %157 = tpu.concatenate %155, %154, %156 in 1 : vector<16x128xf32>, vector<16x128xf32>, vector<16x128xf32> -> vector<16x384xf32>
    %158 = arith.truncf %157 : vector<16x384xf32> to vector<16x384xbf16>
    %c3_100 = arith.constant 3 : index
    %c0_101 = arith.constant 0 : index
    %c0_102 = arith.constant 0 : index
    %159 = vector.load %arg1[%c3_100, %c0_101, %c0_102] : memref<7x384x128xbf16, #tpu.memory_space<vmem>>, vector<1x384x128xbf16>
    %160 = vector.shape_cast %159 : vector<1x384x128xbf16> to vector<384x128xbf16>
    %cst_103 = arith.constant dense<0.000000e+00> : vector<16x128xf32>
    %161 = tpu.matmul %158, %160, %cst_103 {dimension_numbers = #tpu.dot_dimension_numbers<[1], [0], [0], [1], [0, 0, 1, 1], [], []>} : vector<16x384xbf16>, vector<384x128xbf16>, vector<16x128xf32> -> vector<16x128xf32>
    %162 = arith.mulf %161, %0 : vector<16x128xf32>
    %c3_104 = arith.constant 3 : index
    %c0_105 = arith.constant 0 : index
    %c0_106 = arith.constant 0 : index
    %163 = vector.load %arg3[%c3_104, %c0_105, %c0_106] : memref<8x16x128xf32, #tpu.memory_space<vmem>>, vector<1x16x128xf32>
    %164 = vector.shape_cast %163 : vector<1x16x128xf32> to vector<16x128xf32>
    %165 = arith.addf %162, %164 : vector<16x128xf32>
    %c1_i32_107 = arith.constant 1 : i32
    %166 = tpu.dynamic_rotate %165 by %c1_i32_107 dim 0 : vector<16x128xf32>, i32 -> vector<16x128xf32>
    %c15_i32_108 = arith.constant 15 : i32
    %167 = tpu.dynamic_rotate %165 by %c15_i32_108 dim 0 : vector<16x128xf32>, i32 -> vector<16x128xf32>
    %168 = tpu.concatenate %166, %165, %167 in 1 : vector<16x128xf32>, vector<16x128xf32>, vector<16x128xf32> -> vector<16x384xf32>
    %169 = arith.truncf %168 : vector<16x384xf32> to vector<16x384xbf16>
    %c4_109 = arith.constant 4 : index
    %c0_110 = arith.constant 0 : index
    %c0_111 = arith.constant 0 : index
    %170 = vector.load %arg1[%c4_109, %c0_110, %c0_111] : memref<7x384x128xbf16, #tpu.memory_space<vmem>>, vector<1x384x128xbf16>
    %171 = vector.shape_cast %170 : vector<1x384x128xbf16> to vector<384x128xbf16>
    %cst_112 = arith.constant dense<0.000000e+00> : vector<16x128xf32>
    %172 = tpu.matmul %169, %171, %cst_112 {dimension_numbers = #tpu.dot_dimension_numbers<[1], [0], [0], [1], [0, 0, 1, 1], [], []>} : vector<16x384xbf16>, vector<384x128xbf16>, vector<16x128xf32> -> vector<16x128xf32>
    %173 = arith.mulf %172, %0 : vector<16x128xf32>
    %c4_113 = arith.constant 4 : index
    %c0_114 = arith.constant 0 : index
    %c0_115 = arith.constant 0 : index
    %174 = vector.load %arg3[%c4_113, %c0_114, %c0_115] : memref<8x16x128xf32, #tpu.memory_space<vmem>>, vector<1x16x128xf32>
    %175 = vector.shape_cast %174 : vector<1x16x128xf32> to vector<16x128xf32>
    %176 = arith.addf %173, %175 : vector<16x128xf32>
    %cst_116 = arith.constant 0.000000e+00 : f32
    %177 = vector.broadcast %cst_116 : f32 to vector<16x128xf32>
    %178 = arith.cmpf oge, %176, %177 : vector<16x128xf32>
    %cst_117 = arith.constant 1.000000e-01 : f32
    %179 = vector.broadcast %cst_117 : f32 to vector<16x128xf32>
    %180 = arith.mulf %176, %179 : vector<16x128xf32>
    %181 = arith.select %178, %176, %180 : vector<16x128xi1>, vector<16x128xf32>
    %c0_118 = arith.constant 0 : index
    %c0_119 = arith.constant 0 : index
    %182 = vector.load %arg2[%c0_118, %c0_119] : memref<128x128xf32, #tpu.memory_space<vmem>>, vector<128x128xf32>
    %cst_120 = arith.constant dense<0.000000e+00> : vector<16x128xf32>
    %183 = tpu.matmul %154, %182, %cst_120 {dimension_numbers = #tpu.dot_dimension_numbers<[1], [0], [0], [1], [0, 0, 1, 1], [], []>} : vector<16x128xf32>, vector<128x128xf32>, vector<16x128xf32> -> vector<16x128xf32>
    %c7_121 = arith.constant 7 : index
    %c0_122 = arith.constant 0 : index
    %c0_123 = arith.constant 0 : index
    %184 = vector.load %arg3[%c7_121, %c0_122, %c0_123] : memref<8x16x128xf32, #tpu.memory_space<vmem>>, vector<1x16x128xf32>
    %185 = vector.shape_cast %184 : vector<1x16x128xf32> to vector<16x128xf32>
    %186 = arith.addf %183, %185 : vector<16x128xf32>
    %187 = arith.addf %181, %186 : vector<16x128xf32>
    %cst_124 = arith.constant 0.000000e+00 : f32
    %188 = vector.broadcast %cst_124 : f32 to vector<16x128xf32>
    %189 = arith.cmpf oge, %187, %188 : vector<16x128xf32>
    %cst_125 = arith.constant 1.000000e-01 : f32
    %190 = vector.broadcast %cst_125 : f32 to vector<16x128xf32>
    %191 = arith.mulf %187, %190 : vector<16x128xf32>
    %192 = arith.select %189, %187, %191 : vector<16x128xi1>, vector<16x128xf32>
    %c1_i32_126 = arith.constant 1 : i32
    %193 = tpu.dynamic_rotate %192 by %c1_i32_126 dim 0 : vector<16x128xf32>, i32 -> vector<16x128xf32>
    %c15_i32_127 = arith.constant 15 : i32
    %194 = tpu.dynamic_rotate %192 by %c15_i32_127 dim 0 : vector<16x128xf32>, i32 -> vector<16x128xf32>
    %195 = tpu.concatenate %193, %192, %194 in 1 : vector<16x128xf32>, vector<16x128xf32>, vector<16x128xf32> -> vector<16x384xf32>
    %196 = arith.truncf %195 : vector<16x384xf32> to vector<16x384xbf16>
    %c5_128 = arith.constant 5 : index
    %c0_129 = arith.constant 0 : index
    %c0_130 = arith.constant 0 : index
    %197 = vector.load %arg1[%c5_128, %c0_129, %c0_130] : memref<7x384x128xbf16, #tpu.memory_space<vmem>>, vector<1x384x128xbf16>
    %198 = vector.shape_cast %197 : vector<1x384x128xbf16> to vector<384x128xbf16>
    %cst_131 = arith.constant dense<0.000000e+00> : vector<16x128xf32>
    %199 = tpu.matmul %196, %198, %cst_131 {dimension_numbers = #tpu.dot_dimension_numbers<[1], [0], [0], [1], [0, 0, 1, 1], [], []>} : vector<16x384xbf16>, vector<384x128xbf16>, vector<16x128xf32> -> vector<16x128xf32>
    %200 = arith.mulf %199, %0 : vector<16x128xf32>
    %c5_132 = arith.constant 5 : index
    %c0_133 = arith.constant 0 : index
    %c0_134 = arith.constant 0 : index
    %201 = vector.load %arg3[%c5_132, %c0_133, %c0_134] : memref<8x16x128xf32, #tpu.memory_space<vmem>>, vector<1x16x128xf32>
    %202 = vector.shape_cast %201 : vector<1x16x128xf32> to vector<16x128xf32>
    %203 = arith.addf %200, %202 : vector<16x128xf32>
    %cst_135 = arith.constant 0.000000e+00 : f32
    %204 = vector.broadcast %cst_135 : f32 to vector<16x128xf32>
    %205 = arith.cmpf oge, %203, %204 : vector<16x128xf32>
    %cst_136 = arith.constant 1.000000e-01 : f32
    %206 = vector.broadcast %cst_136 : f32 to vector<16x128xf32>
    %207 = arith.mulf %203, %206 : vector<16x128xf32>
    %208 = arith.select %205, %203, %207 : vector<16x128xi1>, vector<16x128xf32>
    %c1_i32_137 = arith.constant 1 : i32
    %209 = tpu.dynamic_rotate %208 by %c1_i32_137 dim 0 : vector<16x128xf32>, i32 -> vector<16x128xf32>
    %c15_i32_138 = arith.constant 15 : i32
    %210 = tpu.dynamic_rotate %208 by %c15_i32_138 dim 0 : vector<16x128xf32>, i32 -> vector<16x128xf32>
    %211 = tpu.concatenate %209, %208, %210 in 1 : vector<16x128xf32>, vector<16x128xf32>, vector<16x128xf32> -> vector<16x384xf32>
    %212 = arith.truncf %211 : vector<16x384xf32> to vector<16x384xbf16>
    %c6_139 = arith.constant 6 : index
    %c0_140 = arith.constant 0 : index
    %c0_141 = arith.constant 0 : index
    %213 = vector.load %arg1[%c6_139, %c0_140, %c0_141] : memref<7x384x128xbf16, #tpu.memory_space<vmem>>, vector<1x384x128xbf16>
    %214 = vector.shape_cast %213 : vector<1x384x128xbf16> to vector<384x128xbf16>
    %cst_142 = arith.constant dense<0.000000e+00> : vector<16x128xf32>
    %215 = tpu.matmul %212, %214, %cst_142 {dimension_numbers = #tpu.dot_dimension_numbers<[1], [0], [0], [1], [0, 0, 1, 1], [], []>} : vector<16x384xbf16>, vector<384x128xbf16>, vector<16x128xf32> -> vector<16x128xf32>
    %216 = arith.mulf %215, %0 : vector<16x128xf32>
    %c6_143 = arith.constant 6 : index
    %c0_144 = arith.constant 0 : index
    %c0_145 = arith.constant 0 : index
    %217 = vector.load %arg3[%c6_143, %c0_144, %c0_145] : memref<8x16x128xf32, #tpu.memory_space<vmem>>, vector<1x16x128xf32>
    %218 = vector.shape_cast %217 : vector<1x16x128xf32> to vector<16x128xf32>
    %219 = arith.addf %216, %218 : vector<16x128xf32>
    %220 = arith.addf %192, %219 : vector<16x128xf32>
    %cst_146 = arith.constant 0.000000e+00 : f32
    %221 = vector.broadcast %cst_146 : f32 to vector<16x128xf32>
    %222 = arith.cmpf oge, %220, %221 : vector<16x128xf32>
    %cst_147 = arith.constant 1.000000e-01 : f32
    %223 = vector.broadcast %cst_147 : f32 to vector<16x128xf32>
    %224 = arith.mulf %220, %223 : vector<16x128xf32>
    %225 = arith.select %222, %220, %224 : vector<16x128xi1>, vector<16x128xf32>
    %c0_148 = arith.constant 0 : index
    %c0_149 = arith.constant 0 : index
    %226 = vector.load %arg5[%c0_148, %c0_149] : memref<4x16xf32, #tpu.memory_space<vmem>>, vector<4x16xf32>
    %cst_150 = arith.constant dense<0.000000e+00> : vector<4x128xf32>
    %227 = tpu.matmul %226, %225, %cst_150 {dimension_numbers = #tpu.dot_dimension_numbers<[1], [0], [0], [1], [0, 0, 1, 1], [], []>} : vector<4x16xf32>, vector<16x128xf32>, vector<4x128xf32> -> vector<4x128xf32>
    %c0_151 = arith.constant 0 : index
    %c0_152 = arith.constant 0 : index
    %228 = vector.load %arg6[%c0_151, %c0_152] : memref<128x80xf32, #tpu.memory_space<vmem>>, vector<128x80xf32>
    %cst_153 = arith.constant dense<0.000000e+00> : vector<4x80xf32>
    %229 = tpu.matmul %227, %228, %cst_153 {dimension_numbers = #tpu.dot_dimension_numbers<[1], [0], [0], [1], [0, 0, 1, 1], [], []>} : vector<4x128xf32>, vector<128x80xf32>, vector<4x80xf32> -> vector<4x80xf32>
    %c0_154 = arith.constant 0 : index
    %c0_155 = arith.constant 0 : index
    %230 = vector.load %arg7[%c0_154, %c0_155] : memref<4x80xf32, #tpu.memory_space<vmem>>, vector<4x80xf32>
    %231 = arith.mulf %229, %230 : vector<4x80xf32>
    %cst_156 = arith.constant dense<0.000000e+00> : vector<80xf32>
    %232 = vector.multi_reduction <add>, %231, %cst_156 [0] : vector<4x80xf32> to vector<80xf32>
    %233 = vector.shape_cast %232 : vector<80xf32> to vector<1x80xf32>
    %c0_157 = arith.constant 0 : index
    %c0_158 = arith.constant 0 : index
    %234 = vector.load %arg8[%c0_157, %c0_158] : memref<80x20xf32, #tpu.memory_space<vmem>>, vector<80x20xf32>
    %cst_159 = arith.constant dense<0.000000e+00> : vector<1x20xf32>
    %235 = tpu.matmul %233, %234, %cst_159 {dimension_numbers = #tpu.dot_dimension_numbers<[1], [0], [0], [1], [0, 0, 1, 1], [], []>} : vector<1x80xf32>, vector<80x20xf32>, vector<1x20xf32> -> vector<1x20xf32>
    %c0_160 = arith.constant 0 : index
    %c0_161 = arith.constant 0 : index
    %236 = vector.load %arg9[%c0_160, %c0_161] : memref<1x20xf32, #tpu.memory_space<vmem>>, vector<1x20xf32>
    %237 = arith.addf %235, %236 : vector<1x20xf32>
    %c0_162 = arith.constant 0 : index
    %c0_163 = arith.constant 0 : index
    %238 = vector.load %arg10[%c0_162, %c0_163] : memref<1x20xf32, #tpu.memory_space<vmem>>, vector<1x20xf32>
    tpu.vector_store %arg10[%c0_162, %c0_163], %237 {strides = array<i32>} : memref<1x20xf32, #tpu.memory_space<vmem>>, vector<1x20xf32>,
    return
  }
}

</mosaic_0001>

<bundles_post_ra>
// kernel: forward.1
= control target key start
LH: loop header
LB: loop body
LE: loop exit
PB: predicated region body
PF: predicated region fallthrough
CT: control target
= control target key end

     0   :  { %15 = vsyncpa [#allocation3], 0  ;;  %s4458_s13 = smov [#allocation2]   ;;  %s5833_s0 = inlined_call_operand.vmem [shape: f32[16,128], index: 0, kind: input, shape index: {}]   ;;  %s5834_s1 = inlined_call_operand.hbm [shape: bf16[7,384,128], index: 1, kind: input, shape index: {}]   ;;  %s5835_s2 = inlined_call_operand.vmem [shape: f32[128,128], index: 2, kind: input, shape index: {}]   ;;  %s5836_s3 = inlined_call_operand.vmem [shape: f32[8,16,128], index: 3, kind: input, shape index: {}]   ;;  %s5837_s4 = inlined_call_operand.vmem [shape: f32[16,128], index: 4, kind: input, shape index: {}]   ;;  %s5838_s5 = inlined_call_operand.vmem [shape: f32[4,16], index: 5, kind: input, shape index: {}]   ;;  %s5839_s6 = inlined_call_operand.vmem [shape: f32[128,80], index: 6, kind: input, shape index: {}]   ;;  %s5840_s7 = inlined_call_operand.vmem [shape: f32[4,80], index: 7, kind: input, shape index: {}]   ;;  %s5841_s8 = inlined_call_operand.vmem [shape: f32[80,20], index: 8, kind: input, shape index: {}]   ;;  %s5842_s9 = inlined_call_operand.vmem [shape: f32[1,20], index: 9, kind: input, shape index: {}]   ;;  %s5843_s10 = inlined_call_operand.vmem [shape: f32[1,20], index: 10, kind: output, shape index: {}]  }
   0x1   :  { %s23_s14 = sshll.u32 %s4458_s13, 4  ;;  %s24_s14 = int_to_ptr.vmem [resolvable:$true] %s23_s14 }
   0x2   :  { %s4444_s15 = scalar_lea.vmem %s24_s14, 21504  ;;  %p4449_p1 = scmp.lt.s32.totalorder %s24_s14, %s24_s14 }
   0x3   :  { %p4445_p0 = scmp.ne.s32.totalorder %s24_s14, %s4444_s15  ;;  %p4450_p2 = scmp.lt.s32.totalorder %s4444_s15, %s4444_s15 }
   0x5   :  { %p4451_p3 = por %p4450_p2, %p4449_p1 }
   0x7   :  { %p4452_p4 = pnand %p4451_p3, %p4445_p0 }
   0x9   :  { %4455 = shalt.err (!%p4452_p4)
}
   0xa   :  { %s4459_s16 = smov 64   ;;  %s4460_s17 = smov 4  }
   0xb   :  { %29 = dma.hbm_to_vmem [thread:$0]  %s5834_s1, 21504, %s24_s14, [#allocation3], %s4459_s16, %s4459_s16, %s4460_s17  }
   0xc   :  { %4456 = dma.done.wait [#allocation3], 21504  }
   0xd   :  { %4457 = vsyncadd [#allocation3], 4294945792  ;;  %v5846_v0 = vmov 0.0   ;;  %vm4462_vm0 = vmmov 0   ;;  %v4265_v1 = vld [vmem:[#allocation2 + $0x78] sm:$0xff]   ;;  %v4268_v4 = vld [vmem:[#allocation2 + $0x70] sm:$0xff]   ;;  %v56_v16 = vlaneseq }
   0xe   :  { %3865 = vmatprep.subr.bf16.mxu1 %v5846_v0  ;;  %3881 = vmatprep.mubr.msk.bf16.mxu1 %vm4462_vm0, %v5846_v0  ;;  %v4266_v2 = vld [vmem:[#allocation2 + $0xb8] sm:$0xff]   ;;  %v4269_v5 = vld [vmem:[#allocation2 + $0xb0] sm:$0xff]   ;;  %v4271_v7 = vld [vmem:[#allocation2 + $0x68] sm:$0xff]  }
   0xf   :  { %3395 = vmatprep.subr.bf16.mxu0 %v4265_v1  ;;  %v4267_v3 = vld [vmem:[#allocation2 + $0x38] sm:$0xff]   ;;  %3866 = vmatpush3.bf16.msra.mxu1 %v4266_v2  ;;  %v4270_v6 = vld [vmem:[#allocation2 + $0x30] sm:$0xff]   ;;  %v4272_v8 = vld [vmem:[#allocation2 + $0xa8] sm:$0xff]   ;;  %v4529_v21 = vshrl.u32 %v56_v16, 7 }
  0x10   :  { %3396 = vmatpush3.bf16.msra.mxu0 %v4267_v3  ;;  %3867 = vmatprep.subr.bf16.mxu1 %v5846_v0  ;;  %v4273_v9 = vld [vmem:[#allocation2 + $0x28] sm:$0xff]   ;;  %v4274_v10 = vld [vmem:[#allocation2 + $0x60] sm:$0xff]   ;;  %v4277_v13 = vld [vmem:[#allocation2 + $0x58] sm:$0xff]  }
  0x11   :  { %3397 = vmatprep.subr.bf16.mxu0 %v4268_v4  ;;  %v4275_v11 = vld [vmem:[#allocation2 + $0xa0] sm:$0xff]   ;;  %v4278_v14 = vld [vmem:[#allocation2 + $0x98] sm:$0xff]   ;;  %v4280_v17 = vld [vmem:[#allocation2 + $0x50] sm:$0xff]   ;;  %vm63_vm1 = vcmp.lt.s32.totalorder %v4529_v21, 7  ;;  %vm58_vm2 = vcmp.lt.s32.totalorder %v4529_v21, 1 }
  0x12   :  { %v4276_v12 = vld [vmem:[#allocation2 + $0x20] sm:$0xff]   ;;  %v4279_v15 = vld [vmem:[#allocation2 + $0x18] sm:$0xff]   ;;  %v4281_v18 = vld [vmem:[#allocation2 + $0x90] sm:$0xff]  }
  0x13   :  { %3868 = vmatpush3.bf16.msra.mxu1 %v4269_v5  ;;  %v4282_v19 = vld [vmem:[#allocation2 + $0x10] sm:$0xff]   ;;  %v4283_v20 = vld [vmem:[#allocation2 + $0x48] sm:$0xff]   ;;  %v4286_v24 = vld [vmem:[#allocation2 + $0x40] sm:$0xff]  }
  0x14   :  { %3398 = vmatpush3.bf16.msra.mxu0 %v4270_v6  ;;  %3869 = vmatprep.subr.bf16.mxu1 %v5846_v0  ;;  %v4284_v22 = vld [vmem:[#allocation2 + $0x88] sm:$0xff]   ;;  %v52_v25 = vld [vmem:[%s5833_s0] sm:$0xff]  ;;  %v4549_v38 = vld [vmem:[#allocation2 + $0x138] sm:$0xff]  }
  0x15   :  { %3399 = vmatprep.subr.bf16.mxu0 %v4271_v7  ;;  %v4285_v23 = vld [vmem:[#allocation2 + $0x8] sm:$0xff]   ;;  %v54_v27 = vrot.slane %v52_v25, 7  ;;  %v61_v29 = vrot.slane %v52_v25, 1  ;;  %v4287_v32 = vld [vmem:[#allocation2 + $0x80] sm:$0xff]   ;;  %v4551_v40 = vld [vmem:[#allocation2 + $0xf8] sm:$0xff]  }
  0x16   :  { %v53_v26 = vld [vmem:[%s5833_s0 + $0x8] sm:$0xff]  ;;  %v4288_v35 = vld [vmem:[#allocation2] sm:$0xff]   ;;  %v4553_v41 = vld [vmem:[#allocation2 + $0x178] sm:$0xff]  }
  0x17   :  { %3870 = vmatpush3.bf16.msra.mxu1 %v4272_v8  ;;  %v55_v28 = vrot.slane %v53_v26, 7  ;;  %v62_v30 = vrot.slane %v53_v26, 1  ;;  %v67_v31 = vpack.c.bf16 %v53_v26, %v52_v25  ;;  %v4555_v43 = vld [vmem:[#allocation2 + $0x130] sm:$0xff]   ;;  %v4572_v46 = vld [vmem:[#allocation2 + $0x128] sm:$0xff]   ;;  %v4581_v49 = vld [vmem:[#allocation2 + $0x120] sm:$0xff]  }
  0x18   :  { %3400 = vmatpush3.bf16.msra.mxu0 %v4273_v9  ;;  %3871 = vmatprep.subr.bf16.mxu1 %v5846_v0  ;;  %v4559_v44 = vld [vmem:[#allocation2 + $0x170] sm:$0xff]   ;;  %v4574_v47 = vld [vmem:[#allocation2 + $0xe8] sm:$0xff]   ;;  %v4584_v50 = vld [vmem:[#allocation2 + $0xe0] sm:$0xff]  }
  0x19   :  { %3401 = vmatprep.subr.bf16.mxu0 %v4274_v10  ;;  %v64_v33 = vsel %vm63_vm1, %v61_v29, %v62_v30  ;;  %v65_v34 = vsel %vm63_vm1, %v62_v30, %v61_v29  ;;  %v59_v36 = vsel %vm58_vm2, %v54_v27, %v55_v28  ;;  %v60_v37 = vsel %vm58_vm2, %v55_v28, %v54_v27  ;;  %v4561_v45 = vld [vmem:[#allocation2 + $0xf0] sm:$0xff]   ;;  %v4576_v48 = vld [vmem:[#allocation2 + $0x168] sm:$0xff]   ;;  %v4586_v51 = vld [vmem:[#allocation2 + $0x160] sm:$0xff]  }
  0x1a   :  { %293 = vmatprep.mubr.bf16.mxu0 %v67_v31  ;;  %v68_v39 = vpack.c.bf16 %v65_v34, %v64_v33  ;;  %v66_v42 = vpack.c.bf16 %v59_v36, %v60_v37  ;;  %v4591_v52 = vld [vmem:[#allocation2 + $0x118] sm:$0xff]   ;;  %v4601_v55 = vld [vmem:[#allocation2 + $0x110] sm:$0xff]   ;;  %v4611_v58 = vld [vmem:[#allocation2 + $0x108] sm:$0xff]  }
  0x1b   :  { %3872 = vmatpush3.bf16.msra.mxu1 %v4275_v11  ;;  %v4594_v53 = vld [vmem:[#allocation2 + $0xd8] sm:$0xff]   ;;  %v4604_v56 = vld [vmem:[#allocation2 + $0xd0] sm:$0xff]   ;;  %v4614_v59 = vld [vmem:[#allocation2 + $0xc8] sm:$0xff]  }
  0x1c   :  { %3402 = vmatpush3.bf16.msra.mxu0 %v4276_v12  ;;  %3873 = vmatprep.subr.bf16.mxu1 %v5846_v0  ;;  %v4596_v54 = vld [vmem:[#allocation2 + $0x158] sm:$0xff]   ;;  %v4606_v57 = vld [vmem:[#allocation2 + $0x150] sm:$0xff]   ;;  %v4616_v60 = vld [vmem:[#allocation2 + $0x148] sm:$0xff]  }
  0x1d   :  { %3403 = vmatprep.subr.bf16.mxu0 %v4277_v13  ;;  %v4619_v61 = vld [vmem:[#allocation2 + $0x100] sm:$0xff]   ;;  %v4632_v1 = vld [vmem:[#allocation2 + $0x1f8] sm:$0xff]   ;;  %v4647_v16 = vld [vmem:[%s5837_s4 + $0x8] sm:$0xff] }
  0x1e   :  { %v4621_v62 = vld [vmem:[#allocation2 + $0xc0] sm:$0xff]   ;;  %v4671_v36 = vld [vmem:[#allocation2 + $0x1b8] sm:$0xff]   ;;  %v3036_v21 = vld [vmem:[%s5839_s6 + $0x68] sm:$0xff] }
  0x1f   :  { %3874 = vmatpush3.bf16.msra.mxu1 %v4278_v14  ;;  %v4627_v63 = vld [vmem:[#allocation2 + $0x140] sm:$0xff]   ;;  %v4673_v37 = vld [vmem:[#allocation2 + $0x238] sm:$0xff]  }
  0x20   :  { %3404 = vmatpush3.bf16.msra.mxu0 %v4279_v15  ;;  %3875 = vmatprep.subr.bf16.mxu1 %v5846_v0  ;;  %v4638_v8 = vld [vmem:[%s5837_s4] sm:$0xff] }
  0x21   :  { %3405 = vmatprep.subr.bf16.mxu0 %v4280_v17  ;;  %v345_v12 = vld [vmem:[%s5836_s3] sm:$0xff] }
  0x23   :  { %3876 = vmatpush3.bf16.msra.mxu1 %v4281_v18 }
  0x24   :  { %3406 = vmatpush3.bf16.msra.mxu0 %v4282_v19  ;;  %3877 = vmatprep.subr.bf16.mxu1 %v5846_v0  ;;  %v346_v19 = vld [vmem:[%s5836_s3 + $0x8] sm:$0xff] }
  0x25   :  { %3407 = vmatprep.subr.bf16.mxu0 %v4283_v20 }
  0x27   :  { %3878 = vmatpush3.bf16.msra.mxu1 %v4284_v22 }
  0x28   :  { %3408 = vmatpush3.bf16.msra.mxu0 %v4285_v23  ;;  %3879 = vmatprep.subr.bf16.mxu1 %v5846_v0 }
  0x29   :  { %3409 = vmatprep.subr.bf16.mxu0 %v4286_v24 }
  0x2b   :  { %3880 = vmatpush3.bf16.msra.mxu1 %v4287_v32 }
  0x2c   :  { %3410 = vmatpush3.bf16.msra.mxu0 %v4288_v35  ;;  %3885 = vmatprep.subr.bf16.mxu1 %v5846_v0 }
  0x2d   :  { %3426 = vmatprep.subr.bf16.mxu0 %v4549_v38 }
  0x2e   :  { %3882 = vmatmul.mubr.bf16.vlgmr.msra.gmra.mxu1 %v68_v39 }
  0x2f   :  { %294 = vmatmul.mubr.bf16.vlgmr.msra.gmra.mxu0 %v66_v42  ;;  %3886 = vmatpush3.bf16.msra.mxu1 %v4553_v41 }
  0x30   :  { %3427 = vmatpush3.bf16.msra.mxu0 %v4551_v40  ;;  %3887 = vmatprep.subr.bf16.mxu1 %v5846_v0 }
  0x31   :  { %3428 = vmatprep.subr.bf16.mxu0 %v4555_v43  ;;  %3901 = vmatprep.mubr.msk.bf16.mxu1 %vm4462_vm0, %v5846_v0 }
  0x33   :  { %3888 = vmatpush3.bf16.msra.mxu1 %v4559_v44 }
  0x34   :  { %3429 = vmatpush3.bf16.msra.mxu0 %v4561_v45  ;;  %3889 = vmatprep.subr.bf16.mxu1 %v5846_v0 }
  0x35   :  { %3430 = vmatprep.subr.bf16.mxu0 %v4572_v46 }
  0x37   :  { %3890 = vmatpush3.bf16.msra.mxu1 %v4576_v48 }
  0x38   :  { %3431 = vmatpush3.bf16.msra.mxu0 %v4574_v47  ;;  %3891 = vmatprep.subr.bf16.mxu1 %v5846_v0 }
  0x39   :  { %3432 = vmatprep.subr.bf16.mxu0 %v4581_v49 }
  0x3b   :  { %3892 = vmatpush3.bf16.msra.mxu1 %v4586_v51 }
  0x3c   :  { %3433 = vmatpush3.bf16.msra.mxu0 %v4584_v50  ;;  %3893 = vmatprep.subr.bf16.mxu1 %v5846_v0 }
  0x3d   :  { %3434 = vmatprep.subr.bf16.mxu0 %v4591_v52 }
  0x3f   :  { %3894 = vmatpush3.bf16.msra.mxu1 %v4596_v54 }
  0x40   :  { %3435 = vmatpush3.bf16.msra.mxu0 %v4594_v53  ;;  %3895 = vmatprep.subr.bf16.mxu1 %v5846_v0 }
  0x41   :  { %3436 = vmatprep.subr.bf16.mxu0 %v4601_v55 }
  0x43   :  { %3896 = vmatpush3.bf16.msra.mxu1 %v4606_v57 }
  0x44   :  { %3437 = vmatpush3.bf16.msra.mxu0 %v4604_v56  ;;  %3897 = vmatprep.subr.bf16.mxu1 %v5846_v0 }
  0x45   :  { %3438 = vmatprep.subr.bf16.mxu0 %v4611_v58 }
  0x47   :  { %3898 = vmatpush3.bf16.msra.mxu1 %v4616_v60 }
  0x48   :  { %3439 = vmatpush3.bf16.msra.mxu0 %v4614_v59  ;;  %3899 = vmatprep.subr.bf16.mxu1 %v5846_v0 }
  0x49   :  { %3440 = vmatprep.subr.bf16.mxu0 %v4619_v61 }
  0x4b   :  { %3900 = vmatpush3.bf16.msra.mxu1 %v4627_v63 }
  0x4c   :  { %3441 = vmatpush3.bf16.msra.mxu0 %v4621_v62  ;;  %3905 = vmatprep.subr.bf16.mxu1 %v5846_v0 }
  0x4d   :  { %3457 = vmatprep.subr.bf16.mxu0 %v4632_v1 }
  0xee   :  { %v336_v2 = vpop.f32.mrf.mxu1 }
  0xef   :  { %v3411_v3 = vpop.f32.mrf.mxu0 }
  0xf0   :  { %v3883_v4 = vpop.f32.mrf.mxu1 }
  0xf1   :  { %v3412_v5 = vpop.f32.mrf.mxu0  ;;  %v4681_v4 = vld [vmem:[#allocation2 + $0x230] sm:$0xff]  }
  0xf2   :  { %v3413_v6 = vadd.f32 %v3412_v5, %v3411_v3  ;;  %v339_v7 = vpop.f32.mrf.mxu1  ;;  %v4679_v3 = vld [vmem:[#allocation2 + $0x1b0] sm:$0xff]   ;;  %v4685_v5 = vld [vmem:[#allocation2 + $0x1e8] sm:$0xff]  }
  0xf3   :  { %v3414_v9 = vpop.f32.mrf.mxu0 }
  0xf4   :  { %v337_v10 = vadd.f32 %v3413_v6, %v336_v2  ;;  %v3884_v11 = vpop.f32.mrf.mxu1  ;;  %v4675_v2 = vld [vmem:[#allocation2 + $0x1f0] sm:$0xff]   ;;  %v4693_v6 = vld [vmem:[#allocation2 + $0x1a8] sm:$0xff]  }
  0xf5   :  { %v3415_v13 = vpop.f32.mrf.mxu0  ;;  %v4704_v11 = vld [vmem:[#allocation2 + $0x220] sm:$0xff]  }
  0xf6   :  { %v343_v14 = vmul.f32 %v337_v10, %v4638_v8  ;;  %v3416_v15 = vadd.f32 %v3415_v13, %v3414_v9  ;;  %v4699_v9 = vld [vmem:[#allocation2 + $0x1e0] sm:$0xff]   ;;  %v4712_v13 = vld [vmem:[#allocation2 + $0x198] sm:$0xff]  }
  0xf7   :  { %v4702_v10 = vld [vmem:[#allocation2 + $0x1a0] sm:$0xff]  }
  0xf8   :  { %v347_v17 = vadd.f32 %v345_v12, %v343_v14  ;;  %v340_v18 = vadd.f32 %v3416_v15, %v339_v7  ;;  %v4695_v7 = vld [vmem:[#allocation2 + $0x228] sm:$0xff]   ;;  %v4709_v12 = vld [vmem:[#allocation2 + $0x1d8] sm:$0xff]   ;;  %v4719_v15 = vld [vmem:[#allocation2 + $0x1d0] sm:$0xff]  }
  0xf9   :  { %v4714_v14 = vld [vmem:[#allocation2 + $0x218] sm:$0xff]  }
  0xfa   :  { %v351_v20 = vmul.f32 0.1, %v347_v17  ;;  %v344_v22 = vmul.f32 %v340_v18, %v4647_v16  ;;  %vm349_vm3 = vcmp.ge.f32.partialorder %v347_v17, 0.0  ;;  %v4724_v18 = vld [vmem:[#allocation2 + $0x210] sm:$0xff]  }
  0xfc   :  { %v348_v23 = vadd.f32 %v346_v19, %v344_v22  ;;  %v4653_v24 = vsel %vm349_vm3, %v347_v17, %v351_v20  ;;  %v4722_v17 = vld [vmem:[#allocation2 + $0x190] sm:$0xff]   ;;  %v4729_v19 = vld [vmem:[#allocation2 + $0x1c8] sm:$0xff]  }
  0xfd   :  { %v355_v27 = vrot.slane %v4653_v24, 7  ;;  %v359_v29 = vrot.slane %v4653_v24, 1  ;;  %v4732_v20 = vld [vmem:[#allocation2 + $0x188] sm:$0xff]  }
  0xfe   :  { %v352_v25 = vmul.f32 0.1, %v348_v23  ;;  %vm350_vm4 = vcmp.ge.f32.partialorder %v348_v23, 0.0  ;;  %v4734_v22 = vld [vmem:[#allocation2 + $0x208] sm:$0xff]  }
  0xff   :  { %5943 = vst [vmem:[#allocation5_spill] sm:$0xff] %v4734_v22 }
 0x100   :  { %v4655_v26 = vsel %vm350_vm4, %v348_v23, %v352_v25  ;;  %v4736_v23 = vld [vmem:[#allocation2 + $0x1c0] sm:$0xff]  }
 0x101   :  { %v356_v28 = vrot.slane %v4655_v26, 7  ;;  %v360_v30 = vrot.slane %v4655_v26, 1  ;;  %v364_v31 = vpack.c.bf16 %v4655_v26, %v4653_v24  ;;  %5944 = vst [vmem:[#allocation6_spill] sm:$0xff] %v4736_v23  ;;  %v4741_v25 = vld [vmem:[#allocation2 + $0x180] sm:$0xff]  }
 0x102   :  { %5945 = vst [vmem:[#allocation7_spill] sm:$0xff] %v4741_v25 }
 0x103   :  { %591 = vmatprep.mubr.bf16.mxu0 %v364_v31  ;;  %v357_v32 = vsel %vm58_vm2, %v355_v27, %v356_v28  ;;  %v358_v33 = vsel %vm58_vm2, %v356_v28, %v355_v27  ;;  %v361_v34 = vsel %vm63_vm1, %v359_v29, %v360_v30  ;;  %v362_v35 = vsel %vm63_vm1, %v360_v30, %v359_v29  ;;  %v4745_v27 = vld [vmem:[#allocation2 + $0x200] sm:$0xff]  }
 0x104   :  { %v363_v39 = vpack.c.bf16 %v357_v32, %v358_v33  ;;  %v365_v42 = vpack.c.bf16 %v362_v35, %v361_v34  ;;  %5946 = vst [vmem:[#allocation8_spill] sm:$0xff] %v4745_v27 }
 0x106   :  { %592 = vmatmul.mubr.bf16.vlgmr.msra.gmra.mxu0 %v363_v39  ;;  %3902 = vmatmul.mubr.bf16.vlgmr.msra.gmra.mxu1 %v365_v42  ;;  %v4754_v39 = vld [vmem:[%s5836_s3 + $0x10] sm:$0xff] }
 0x107   :  { %3458 = vmatpush3.bf16.msra.mxu0 %v4671_v36  ;;  %3906 = vmatpush3.bf16.msra.mxu1 %v4673_v37  ;;  %5947 = vst [vmem:[#allocation9_spill] sm:$0xff] %v4754_v39 }
 0x108   :  { %3459 = vmatprep.subr.bf16.mxu0 %v4675_v2  ;;  %3907 = vmatprep.subr.bf16.mxu1 %v5846_v0 }
 0x109   :  { %3921 = vmatprep.mubr.msk.bf16.mxu1 %vm4462_vm0, %v5846_v0 }
 0x10b   :  { %3460 = vmatpush3.bf16.msra.mxu0 %v4679_v3  ;;  %3908 = vmatpush3.bf16.msra.mxu1 %v4681_v4 }
 0x10c   :  { %3461 = vmatprep.subr.bf16.mxu0 %v4685_v5  ;;  %3909 = vmatprep.subr.bf16.mxu1 %v5846_v0 }
 0x10f   :  { %3462 = vmatpush3.bf16.msra.mxu0 %v4693_v6  ;;  %3910 = vmatpush3.bf16.msra.mxu1 %v4695_v7 }
 0x110   :  { %3911 = vmatprep.subr.bf16.mxu1 %v5846_v0  ;;  %3463 = vmatprep.subr.bf16.mxu0 %v4699_v9 }
 0x113   :  { %3464 = vmatpush3.bf16.msra.mxu0 %v4702_v10  ;;  %3912 = vmatpush3.bf16.msra.mxu1 %v4704_v11 }
 0x114   :  { %3913 = vmatprep.subr.bf16.mxu1 %v5846_v0  ;;  %3465 = vmatprep.subr.bf16.mxu0 %v4709_v12 }
 0x117   :  { %3466 = vmatpush3.bf16.msra.mxu0 %v4712_v13  ;;  %3914 = vmatpush3.bf16.msra.mxu1 %v4714_v14 }
 0x118   :  { %3915 = vmatprep.subr.bf16.mxu1 %v5846_v0  ;;  %3467 = vmatprep.subr.bf16.mxu0 %v4719_v15 }
 0x11b   :  { %3468 = vmatpush3.bf16.msra.mxu0 %v4722_v17  ;;  %3916 = vmatpush3.bf16.msra.mxu1 %v4724_v18 }
 0x11c   :  { %3917 = vmatprep.subr.bf16.mxu1 %v5846_v0  ;;  %3469 = vmatprep.subr.bf16.mxu0 %v4729_v19 }
 0x11f   :  { %3470 = vmatpush3.bf16.msra.mxu0 %v4732_v20  ;;  %3918 = vmatpush3.bf16.msra.mxu1 %v4734_v22 }
 0x120   :  { %3471 = vmatprep.subr.bf16.mxu0 %v4736_v23  ;;  %3919 = vmatprep.subr.bf16.mxu1 %v5846_v0 }
 0x123   :  { %3472 = vmatpush3.bf16.msra.mxu0 %v4741_v25  ;;  %3920 = vmatpush3.bf16.msra.mxu1 %v4745_v27 }
 0x124   :  { %3488 = vmatprep.subr.bf16.mxu0 %v4549_v38  ;;  %3925 = vmatprep.subr.bf16.mxu1 %v5846_v0 }
 0x1c6   :  { %v3442_v28 = vpop.f32.mrf.mxu0  ;;  %v634_v29 = vpop.f32.mrf.mxu1 }
 0x1c8   :  { %v3443_v30 = vpop.f32.mrf.mxu0  ;;  %v3903_v31 = vpop.f32.mrf.mxu1 }
 0x1c9   :  { %v3444_v32 = vadd.f32 %v3443_v30, %v3442_v28  ;;  %v4761_v28 = vld [vmem:[%s5836_s3 + $0x18] sm:$0xff] }
 0x1ca   :  { %v3445_v33 = vpop.f32.mrf.mxu0  ;;  %v637_v34 = vpop.f32.mrf.mxu1 }
 0x1cb   :  { %v635_v35 = vadd.f32 %v3444_v32, %v634_v29 }
 0x1cc   :  { %v3446_v42 = vpop.f32.mrf.mxu0  ;;  %v3904_v25 = vpop.f32.mrf.mxu1 }
 0x1cd   :  { %v641_v27 = vmul.f32 %v635_v35, %v4638_v8  ;;  %v3447_v38 = vadd.f32 %v3446_v42, %v3445_v33 }
 0x1cf   :  { %v646_v0 = vadd.f32 %v4754_v39, %v641_v27  ;;  %v638_v23 = vadd.f32 %v3447_v38, %v637_v34 }
 0x1d1   :  { %v642_v29 = vmul.f32 %v638_v23, %v4647_v16  ;;  %vm648_vm5 = vcmp.ge.f32.partialorder %v646_v0, 0.0  ;;  %v650_v30 = vmul.f32 0.1, %v646_v0 }
 0x1d3   :  { %v647_v31 = vadd.f32 %v4761_v28, %v642_v29  ;;  %v652_v32 = vsel %vm648_vm5, %v646_v0, %v650_v30 }
 0x1d4   :  { %v654_v35 = vrot.slane %v652_v32, 7  ;;  %v658_v42 = vrot.slane %v652_v32, 1 }
 0x1d5   :  { %vm649_vm6 = vcmp.ge.f32.partialorder %v647_v31, 0.0  ;;  %v651_v25 = vmul.f32 0.1, %v647_v31 }
 0x1d7   :  { %v653_v22 = vsel %vm649_vm6, %v647_v31, %v651_v25 }
 0x1d8   :  { %v655_v33 = vrot.slane %v653_v22, 7  ;;  %v659_v27 = vrot.slane %v653_v22, 1  ;;  %v663_v34 = vpack.c.bf16 %v653_v22, %v652_v32  ;;  %v5948_v22 = vmov 0.0  }
 0x1da   :  { %890 = vmatprep.mubr.bf16.mxu0 %v663_v34  ;;  %v656_v38 = vsel %vm58_vm2, %v654_v35, %v655_v33  ;;  %v657_v23 = vsel %vm58_vm2, %v655_v33, %v654_v35  ;;  %v660_v39 = vsel %vm63_vm1, %v658_v42, %v659_v27  ;;  %v661_v0 = vsel %vm63_vm1, %v659_v27, %v658_v42 }
 0x1db   :  { %v662_v29 = vpack.c.bf16 %v656_v38, %v657_v23  ;;  %v664_v30 = vpack.c.bf16 %v661_v0, %v660_v39 }
 0x1dd   :  { %891 = vmatmul.mubr.bf16.vlgmr.msra.gmra.mxu0 %v662_v29  ;;  %3922 = vmatmul.mubr.bf16.vlgmr.msra.gmra.mxu1 %v664_v30 }
 0x1de   :  { %3489 = vmatpush3.bf16.msra.mxu0 %v4551_v40  ;;  %3926 = vmatpush3.bf16.msra.mxu1 %v4553_v41 }
 0x1df   :  { %3490 = vmatprep.subr.bf16.mxu0 %v4555_v43  ;;  %3927 = vmatprep.subr.bf16.mxu1 %v5948_v22 }
 0x1e0   :  { %3941 = vmatprep.mubr.msk.bf16.mxu1 %vm4462_vm0, %v5948_v22 }
 0x1e2   :  { %3491 = vmatpush3.bf16.msra.mxu0 %v4561_v45  ;;  %3928 = vmatpush3.bf16.msra.mxu1 %v4559_v44 }
 0x1e3   :  { %3492 = vmatprep.subr.bf16.mxu0 %v4572_v46  ;;  %3929 = vmatprep.subr.bf16.mxu1 %v5948_v22 }
 0x1e6   :  { %3493 = vmatpush3.bf16.msra.mxu0 %v4574_v47  ;;  %3930 = vmatpush3.bf16.msra.mxu1 %v4576_v48 }
 0x1e7   :  { %3494 = vmatprep.subr.bf16.mxu0 %v4581_v49  ;;  %3931 = vmatprep.subr.bf16.mxu1 %v5948_v22  ;;  %v4810_v49 = vld [vmem:[%s5836_s3 + $0x20] sm:$0xff] }
 0x1ea   :  { %3495 = vmatpush3.bf16.msra.mxu0 %v4584_v50  ;;  %3932 = vmatpush3.bf16.msra.mxu1 %v4586_v51 }
 0x1eb   :  { %3496 = vmatprep.subr.bf16.mxu0 %v4591_v52  ;;  %3933 = vmatprep.subr.bf16.mxu1 %v5948_v22 }
 0x1ee   :  { %3497 = vmatpush3.bf16.msra.mxu0 %v4594_v53  ;;  %3934 = vmatpush3.bf16.msra.mxu1 %v4596_v54 }
 0x1ef   :  { %3498 = vmatprep.subr.bf16.mxu0 %v4601_v55  ;;  %3935 = vmatprep.subr.bf16.mxu1 %v5948_v22 }
 0x1f2   :  { %3499 = vmatpush3.bf16.msra.mxu0 %v4604_v56  ;;  %3936 = vmatpush3.bf16.msra.mxu1 %v4606_v57  ;;  %v4817_v56 = vld [vmem:[%s5836_s3 + $0x28] sm:$0xff] }
 0x1f3   :  { %3500 = vmatprep.subr.bf16.mxu0 %v4611_v58  ;;  %3937 = vmatprep.subr.bf16.mxu1 %v5948_v22 }
 0x1f6   :  { %3501 = vmatpush3.bf16.msra.mxu0 %v4614_v59  ;;  %3938 = vmatpush3.bf16.msra.mxu1 %v4616_v60 }
 0x1f7   :  { %3502 = vmatprep.subr.bf16.mxu0 %v4619_v61  ;;  %3939 = vmatprep.subr.bf16.mxu1 %v5948_v22 }
 0x1fa   :  { %3503 = vmatpush3.bf16.msra.mxu0 %v4621_v62  ;;  %3940 = vmatpush3.bf16.msra.mxu1 %v4627_v63 }
 0x1fb   :  { %3519 = vmatprep.subr.bf16.mxu0 %v4632_v1  ;;  %3945 = vmatprep.subr.bf16.mxu1 %v5948_v22 }
 0x29d   :  { %v3473_v40 = vpop.f32.mrf.mxu0  ;;  %v933_v41 = vpop.f32.mrf.mxu1 }
 0x29f   :  { %v3474_v43 = vpop.f32.mrf.mxu0  ;;  %v3923_v44 = vpop.f32.mrf.mxu1 }
 0x2a0   :  { %v3475_v45 = vadd.f32 %v3474_v43, %v3473_v40 }
 0x2a1   :  { %v3476_v46 = vpop.f32.mrf.mxu0  ;;  %v936_v47 = vpop.f32.mrf.mxu1 }
 0x2a2   :  { %v934_v48 = vadd.f32 %v3475_v45, %v933_v41 }
 0x2a3   :  { %v3477_v50 = vpop.f32.mrf.mxu0  ;;  %v3924_v51 = vpop.f32.mrf.mxu1 }
 0x2a4   :  { %v940_v52 = vmul.f32 %v934_v48, %v4638_v8  ;;  %v3478_v53 = vadd.f32 %v3477_v50, %v3476_v46 }
 0x2a6   :  { %v945_v54 = vadd.f32 %v4810_v49, %v940_v52  ;;  %v937_v55 = vadd.f32 %v3478_v53, %v936_v47  ;;  %v4889_v52 = vld [vmem:[#allocation2 + $0x278] sm:$0xff]  }
 0x2a7   :  { %v4891_v53 = vld [vmem:[#allocation2 + $0x2f8] sm:$0xff]  }
 0x2a8   :  { %v947_v57 = vadd.f32 %v945_v54, %v4653_v24  ;;  %v941_v58 = vmul.f32 %v937_v55, %v4647_v16 }
 0x2aa   :  { %v946_v59 = vadd.f32 %v4817_v56, %v941_v58  ;;  %vm949_vm7 = vcmp.ge.f32.partialorder %v947_v57, 0.0  ;;  %v951_v60 = vmul.f32 0.1, %v947_v57  ;;  %v4897_v58 = vld [vmem:[#allocation2 + $0x270] sm:$0xff]  }
 0x2ac   :  { %v948_v61 = vadd.f32 %v946_v59, %v4655_v26  ;;  %v4823_v62 = vsel %vm949_vm7, %v947_v57, %v951_v60  ;;  %v4893_v57 = vld [vmem:[#allocation2 + $0x2b0] sm:$0xff]   ;;  %v4908_v60 = vld [vmem:[#allocation2 + $0x2a8] sm:$0xff]  }
 0x2ad   :  { %v955_v39 = vrot.slane %v4823_v62, 7  ;;  %v959_v24 = vrot.slane %v4823_v62, 1  ;;  %v4899_v59 = vld [vmem:[#allocation2 + $0x2f0] sm:$0xff]  }
 0x2ae   :  { %vm950_vm8 = vcmp.ge.f32.partialorder %v948_v61, 0.0  ;;  %v952_v63 = vmul.f32 0.1, %v948_v61 }
 0x2b0   :  { %v4825_v1 = vsel %vm950_vm8, %v948_v61, %v952_v63  ;;  %v4910_v61 = vld [vmem:[#allocation2 + $0x268] sm:$0xff]  }
 0x2b1   :  { %v956_v31 = vrot.slane %v4825_v1, 7  ;;  %v960_v32 = vrot.slane %v4825_v1, 1  ;;  %v964_v25 = vpack.c.bf16 %v4825_v1, %v4823_v62  ;;  %v4912_v63 = vld [vmem:[#allocation2 + $0x2e8] sm:$0xff]  }
 0x2b3   :  { %998 = vmatprep.mubr.bf16.mxu0 %v964_v25  ;;  %v957_v26 = vsel %vm58_vm2, %v955_v39, %v956_v31  ;;  %v958_v35 = vsel %vm58_vm2, %v956_v31, %v955_v39  ;;  %v961_v33 = vsel %vm63_vm1, %v959_v24, %v960_v32  ;;  %v962_v42 = vsel %vm63_vm1, %v960_v32, %v959_v24  ;;  %v4917_v39 = vld [vmem:[#allocation2 + $0x2a0] sm:$0xff]   ;;  %v4927_v32 = vld [vmem:[#allocation2 + $0x298] sm:$0xff]  }
 0x2b4   :  { %v963_v27 = vpack.c.bf16 %v957_v26, %v958_v35  ;;  %v965_v34 = vpack.c.bf16 %v962_v42, %v961_v33  ;;  %v4920_v31 = vld [vmem:[#allocation2 + $0x260] sm:$0xff]   ;;  %v4930_v25 = vld [vmem:[#allocation2 + $0x258] sm:$0xff]   ;;  %v4937_v35 = vld [vmem:[#allocation2 + $0x290] sm:$0xff]  }
 0x2b5   :  { %v4922_v24 = vld [vmem:[#allocation2 + $0x2e0] sm:$0xff]   ;;  %v4932_v26 = vld [vmem:[#allocation2 + $0x2d8] sm:$0xff]   ;;  %v4940_v33 = vld [vmem:[#allocation2 + $0x250] sm:$0xff]  }
 0x2b6   :  { %999 = vmatmul.mubr.bf16.vlgmr.msra.gmra.mxu0 %v963_v27  ;;  %3942 = vmatmul.mubr.bf16.vlgmr.msra.gmra.mxu1 %v965_v34  ;;  %v4942_v42 = vld [vmem:[#allocation2 + $0x2d0] sm:$0xff]   ;;  %v4947_v27 = vld [vmem:[#allocation2 + $0x288] sm:$0xff]  }
 0x2b7   :  { %3520 = vmatpush3.bf16.msra.mxu0 %v4671_v36  ;;  %3946 = vmatpush3.bf16.msra.mxu1 %v4673_v37  ;;  %v5949_v36 = vld [vmem:[#allocation5_spill] sm:$0xff]  ;;  %v5950_v37 = vld [vmem:[#allocation6_spill] sm:$0xff] }
 0x2b8   :  { %3521 = vmatprep.subr.bf16.mxu0 %v4675_v2  ;;  %3947 = vmatprep.subr.bf16.mxu1 %v5948_v22  ;;  %v5951_v2 = vld [vmem:[#allocation7_spill] sm:$0xff]  ;;  %v4950_v34 = vld [vmem:[#allocation2 + $0x248] sm:$0xff]  }
 0x2b9   :  { %3961 = vmatprep.mubr.msk.bf16.mxu1 %vm4462_vm0, %v5948_v22 }
 0x2bb   :  { %3522 = vmatpush3.bf16.msra.mxu0 %v4679_v3  ;;  %3948 = vmatpush3.bf16.msra.mxu1 %v4681_v4  ;;  %v5952_v3 = vld [vmem:[#allocation8_spill] sm:$0xff] }
 0x2bc   :  { %3523 = vmatprep.subr.bf16.mxu0 %v4685_v5  ;;  %3949 = vmatprep.subr.bf16.mxu1 %v5948_v22  ;;  %v4874_v4 = vld [vmem:[#allocation2 + $0x2b8] sm:$0xff]  }
 0x2bf   :  { %3524 = vmatpush3.bf16.msra.mxu0 %v4693_v6  ;;  %3950 = vmatpush3.bf16.msra.mxu1 %v4695_v7 }
 0x2c0   :  { %3525 = vmatprep.subr.bf16.mxu0 %v4699_v9  ;;  %3951 = vmatprep.subr.bf16.mxu1 %v5948_v22 }
 0x2c3   :  { %3526 = vmatpush3.bf16.msra.mxu0 %v4702_v10  ;;  %3952 = vmatpush3.bf16.msra.mxu1 %v4704_v11 }
 0x2c4   :  { %3527 = vmatprep.subr.bf16.mxu0 %v4709_v12  ;;  %3953 = vmatprep.subr.bf16.mxu1 %v5948_v22 }
 0x2c7   :  { %3528 = vmatpush3.bf16.msra.mxu0 %v4712_v13  ;;  %3954 = vmatpush3.bf16.msra.mxu1 %v4714_v14 }
 0x2c8   :  { %3529 = vmatprep.subr.bf16.mxu0 %v4719_v15  ;;  %3955 = vmatprep.subr.bf16.mxu1 %v5948_v22 }
 0x2cb   :  { %3530 = vmatpush3.bf16.msra.mxu0 %v4722_v17  ;;  %3956 = vmatpush3.bf16.msra.mxu1 %v4724_v18 }
 0x2cc   :  { %3531 = vmatprep.subr.bf16.mxu0 %v4729_v19  ;;  %3957 = vmatprep.subr.bf16.mxu1 %v5948_v22  ;;  %v5953_v19 = vld [vmem:[#allocation9_spill] sm:$0xff] }
 0x2cf   :  { %3532 = vmatpush3.bf16.msra.mxu0 %v4732_v20  ;;  %3958 = vmatpush3.bf16.msra.mxu1 %v5949_v36  ;;  %v4952_v36 = vld [vmem:[#allocation2 + $0x2c8] sm:$0xff]  }
 0x2d0   :  { %3533 = vmatprep.subr.bf16.mxu0 %v5950_v37  ;;  %3959 = vmatprep.subr.bf16.mxu1 %v5948_v22  ;;  %v4954_v37 = vld [vmem:[#allocation2 + $0x280] sm:$0xff]  }
 0x2d3   :  { %3534 = vmatpush3.bf16.msra.mxu0 %v5951_v2  ;;  %3960 = vmatpush3.bf16.msra.mxu1 %v5952_v3  ;;  %v4959_v2 = vld [vmem:[#allocation2 + $0x240] sm:$0xff]  }
 0x2d4   :  { %3965 = vmatprep.subr.bf16.mxu1 %v5948_v22  ;;  %3550 = vmatprep.subr.bf16.mxu0 %v4874_v4  ;;  %v4963_v3 = vld [vmem:[#allocation2 + $0x2c0] sm:$0xff]  }
 0x376   :  { %v3504_v5 = vpop.f32.mrf.mxu0  ;;  %v1041_v6 = vpop.f32.mrf.mxu1 }
 0x378   :  { %v3505_v7 = vpop.f32.mrf.mxu0  ;;  %v3943_v9 = vpop.f32.mrf.mxu1 }
 0x379   :  { %v3506_v10 = vadd.f32 %v3505_v7, %v3504_v5  ;;  %v4968_v5 = vld [vmem:[#allocation2 + $0x378] sm:$0xff]  }
 0x37a   :  { %v3507_v11 = vpop.f32.mrf.mxu0  ;;  %v1044_v12 = vpop.f32.mrf.mxu1 }
 0x37b   :  { %v1042_v13 = vadd.f32 %v3506_v10, %v1041_v6 }
 0x37c   :  { %v3508_v14 = vpop.f32.mrf.mxu0  ;;  %v3944_v15 = vpop.f32.mrf.mxu1 }
 0x37d   :  { %v1048_v17 = vmul.f32 %v1042_v13, %v4638_v8  ;;  %v3509_v18 = vadd.f32 %v3508_v14, %v3507_v11 }
 0x37f   :  { %v1050_v20 = vadd.f32 %v5953_v19, %v1048_v17  ;;  %v1045_v38 = vadd.f32 %v3509_v18, %v1044_v12 }
 0x381   :  { %v1049_v23 = vmul.f32 %v1045_v38, %v4647_v16  ;;  %vm1052_vm9 = vcmp.ge.f32.partialorder %v1050_v20, 0.0  ;;  %v1054_v0 = vmul.f32 0.1, %v1050_v20 }
 0x383   :  { %v1051_v29 = vadd.f32 %v4761_v28, %v1049_v23  ;;  %v1056_v30 = vsel %vm1052_vm9, %v1050_v20, %v1054_v0 }
 0x384   :  { %v1058_v43 = vrot.slane %v1056_v30, 7  ;;  %v1062_v45 = vrot.slane %v1056_v30, 1 }
 0x385   :  { %vm1053_vm10 = vcmp.ge.f32.partialorder %v1051_v29, 0.0  ;;  %v1055_v40 = vmul.f32 0.1, %v1051_v29 }
 0x387   :  { %v1057_v41 = vsel %vm1053_vm10, %v1051_v29, %v1055_v40 }
 0x388   :  { %v1059_v44 = vrot.slane %v1057_v41, 7  ;;  %v1063_v46 = vrot.slane %v1057_v41, 1  ;;  %v1067_v47 = vpack.c.bf16 %v1057_v41, %v1056_v30 }
 0x38a   :  { %1101 = vmatprep.mubr.bf16.mxu0 %v1067_v47  ;;  %v1060_v48 = vsel %vm58_vm2, %v1058_v43, %v1059_v44  ;;  %v1061_v50 = vsel %vm58_vm2, %v1059_v44, %v1058_v43  ;;  %v1064_v51 = vsel %vm63_vm1, %v1062_v45, %v1063_v46  ;;  %v1065_v28 = vsel %vm63_vm1, %v1063_v46, %v1062_v45 }
 0x38b   :  { %v1066_v54 = vpack.c.bf16 %v1060_v48, %v1061_v50  ;;  %v1068_v55 = vpack.c.bf16 %v1065_v28, %v1064_v51  ;;  %v4995_v51 = vld [vmem:[#allocation2 + $0x338] sm:$0xff]  }
 0x38c   :  { %v4997_v28 = vld [vmem:[#allocation2 + $0x3b8] sm:$0xff]  }
 0x38d   :  { %1102 = vmatmul.mubr.bf16.vlgmr.msra.gmra.mxu0 %v1066_v54  ;;  %3962 = vmatmul.mubr.bf16.vlgmr.msra.gmra.mxu1 %v1068_v55 }
 0x38e   :  { %3551 = vmatpush3.bf16.msra.mxu0 %v4889_v52  ;;  %3966 = vmatpush3.bf16.msra.mxu1 %v4891_v53 }
 0x38f   :  { %3552 = vmatprep.subr.bf16.mxu0 %v4893_v57  ;;  %3967 = vmatprep.subr.bf16.mxu1 %v5948_v22 }
 0x390   :  { %3981 = vmatprep.mubr.msk.bf16.mxu1 %vm4462_vm0, %v5948_v22 }
 0x392   :  { %3553 = vmatpush3.bf16.msra.mxu0 %v4897_v58  ;;  %3968 = vmatpush3.bf16.msra.mxu1 %v4899_v59 }
 0x393   :  { %3969 = vmatprep.subr.bf16.mxu1 %v5948_v22  ;;  %3554 = vmatprep.subr.bf16.mxu0 %v4908_v60 }
 0x396   :  { %3555 = vmatpush3.bf16.msra.mxu0 %v4910_v61  ;;  %3970 = vmatpush3.bf16.msra.mxu1 %v4912_v63 }
 0x397   :  { %3971 = vmatprep.subr.bf16.mxu1 %v5948_v22  ;;  %3556 = vmatprep.subr.bf16.mxu0 %v4917_v39 }
 0x39a   :  { %3557 = vmatpush3.bf16.msra.mxu0 %v4920_v31  ;;  %3972 = vmatpush3.bf16.msra.mxu1 %v4922_v24 }
 0x39b   :  { %3973 = vmatprep.subr.bf16.mxu1 %v5948_v22  ;;  %3558 = vmatprep.subr.bf16.mxu0 %v4927_v32 }
 0x39e   :  { %3559 = vmatpush3.bf16.msra.mxu0 %v4930_v25  ;;  %3974 = vmatpush3.bf16.msra.mxu1 %v4932_v26 }
 0x39f   :  { %3975 = vmatprep.subr.bf16.mxu1 %v5948_v22  ;;  %3560 = vmatprep.subr.bf16.mxu0 %v4937_v35 }
 0x3a2   :  { %3561 = vmatpush3.bf16.msra.mxu0 %v4940_v33  ;;  %3976 = vmatpush3.bf16.msra.mxu1 %v4942_v42 }
 0x3a3   :  { %3977 = vmatprep.subr.bf16.mxu1 %v5948_v22  ;;  %3562 = vmatprep.subr.bf16.mxu0 %v4947_v27 }
 0x3a6   :  { %3563 = vmatpush3.bf16.msra.mxu0 %v4950_v34  ;;  %3978 = vmatpush3.bf16.msra.mxu1 %v4952_v36 }
 0x3a7   :  { %3564 = vmatprep.subr.bf16.mxu0 %v4954_v37  ;;  %3979 = vmatprep.subr.bf16.mxu1 %v5948_v22 }
 0x3aa   :  { %3565 = vmatpush3.bf16.msra.mxu0 %v4959_v2  ;;  %3980 = vmatpush3.bf16.msra.mxu1 %v4963_v3 }
 0x3ab   :  { %3985 = vmatprep.subr.bf16.mxu1 %v5948_v22  ;;  %3581 = vmatprep.subr.bf16.mxu0 %v4968_v5 }
 0x44d   :  { %v3535_v6 = vpop.f32.mrf.mxu0  ;;  %v1144_v7 = vpop.f32.mrf.mxu1 }
 0x44f   :  { %v3536_v9 = vpop.f32.mrf.mxu0  ;;  %v3963_v10 = vpop.f32.mrf.mxu1 }
 0x450   :  { %v3537_v11 = vadd.f32 %v3536_v9, %v3535_v6  ;;  %v4999_v6 = vld [vmem:[#allocation2 + $0x370] sm:$0xff]   ;;  %v5009_v10 = vld [vmem:[#allocation2 + $0x368] sm:$0xff]  }
 0x451   :  { %v3538_v12 = vpop.f32.mrf.mxu0  ;;  %v1147_v13 = vpop.f32.mrf.mxu1  ;;  %v5005_v9 = vld [vmem:[#allocation2 + $0x3b0] sm:$0xff]  }
 0x452   :  { %v1145_v14 = vadd.f32 %v3537_v11, %v1144_v7  ;;  %v5003_v7 = vld [vmem:[#allocation2 + $0x330] sm:$0xff]   ;;  %v5015_v11 = vld [vmem:[#allocation2 + $0x328] sm:$0xff]  }
 0x453   :  { %v3539_v15 = vpop.f32.mrf.mxu0  ;;  %v3964_v17 = vpop.f32.mrf.mxu1 }
 0x454   :  { %v1151_v18 = vmul.f32 %v1145_v14, %v4638_v8  ;;  %v3540_v19 = vadd.f32 %v3539_v15, %v3538_v12  ;;  %v5017_v12 = vld [vmem:[#allocation2 + $0x3a8] sm:$0xff]   ;;  %v5027_v14 = vld [vmem:[#allocation2 + $0x320] sm:$0xff]   ;;  %v5033_v17 = vld [vmem:[#allocation2 + $0x358] sm:$0xff]  }
 0x455   :  { %v5029_v15 = vld [vmem:[#allocation2 + $0x3a0] sm:$0xff]  }
 0x456   :  { %v1153_v20 = vadd.f32 %v4810_v49, %v1151_v18  ;;  %v1148_v38 = vadd.f32 %v3540_v19, %v1147_v13  ;;  %v5021_v13 = vld [vmem:[#allocation2 + $0x360] sm:$0xff]   ;;  %v5035_v18 = vld [vmem:[#allocation2 + $0x318] sm:$0xff]  }
 0x457   :  { %v5039_v19 = vld [vmem:[#allocation2 + $0x398] sm:$0xff]  }
 0x458   :  { %v1155_v23 = vadd.f32 %v1153_v20, %v4823_v62  ;;  %v1152_v0 = vmul.f32 %v1148_v38, %v4647_v16  ;;  %v5043_v20 = vld [vmem:[#allocation2 + $0x350] sm:$0xff]  }
 0x459   :  { %v5045_v38 = vld [vmem:[#allocation2 + $0x310] sm:$0xff]  }
 0x45a   :  { %v1154_v29 = vadd.f32 %v4817_v56, %v1152_v0  ;;  %vm1157_vm11 = vcmp.ge.f32.partialorder %v1155_v23, 0.0  ;;  %v1159_v30 = vmul.f32 0.1, %v1155_v23  ;;  %v5053_v0 = vld [vmem:[#allocation2 + $0x348] sm:$0xff]  }
 0x45b   :  { %5955 = vst [vmem:[#allocation6_spill] sm:$0xff] %v5053_v0 }
 0x45c   :  { %v1156_v40 = vadd.f32 %v1154_v29, %v4825_v1  ;;  %v4977_v41 = vsel %vm1157_vm11, %v1155_v23, %v1159_v30  ;;  %v5049_v23 = vld [vmem:[#allocation2 + $0x390] sm:$0xff]   ;;  %v5055_v29 = vld [vmem:[#allocation2 + $0x308] sm:$0xff]  }
 0x45d   :  { %v1163_v45 = vrot.slane %v4977_v41, 7  ;;  %v1167_v62 = vrot.slane %v4977_v41, 1  ;;  %5954 = vst [vmem:[#allocation5_spill] sm:$0xff] %v5049_v23  ;;  %5956 = vst [vmem:[#allocation7_spill] sm:$0xff] %v5055_v29  ;;  %v5059_v30 = vld [vmem:[#allocation2 + $0x388] sm:$0xff]  }
 0x45e   :  { %vm1158_vm12 = vcmp.ge.f32.partialorder %v1156_v40, 0.0  ;;  %v1160_v43 = vmul.f32 0.1, %v1156_v40  ;;  %5957 = vst [vmem:[#allocation8_spill] sm:$0xff] %v5059_v30 }
 0x460   :  { %v4979_v44 = vsel %vm1158_vm12, %v1156_v40, %v1160_v43  ;;  %v5063_v40 = vld [vmem:[#allocation2 + $0x340] sm:$0xff]  }
 0x461   :  { %v1164_v49 = vrot.slane %v4979_v44, 7  ;;  %v1168_v46 = vrot.slane %v4979_v44, 1  ;;  %v1172_v56 = vpack.c.bf16 %v4979_v44, %v4977_v41  ;;  %5958 = vst [vmem:[#allocation9_spill] sm:$0xff] %v5063_v40  ;;  %v5065_v43 = vld [vmem:[#allocation2 + $0x300] sm:$0xff]  }
 0x462   :  { %5959 = vst [vmem:[#allocation10_spill] sm:$0xff] %v5065_v43 }
 0x463   :  { %1399 = vmatprep.mubr.bf16.mxu0 %v1172_v56  ;;  %v1165_v1 = vsel %vm58_vm2, %v1163_v45, %v1164_v49  ;;  %v1166_v47 = vsel %vm58_vm2, %v1164_v49, %v1163_v45  ;;  %v1169_v48 = vsel %vm63_vm1, %v1167_v62, %v1168_v46  ;;  %v1170_v50 = vsel %vm63_vm1, %v1168_v46, %v1167_v62  ;;  %v5069_v45 = vld [vmem:[#allocation2 + $0x380] sm:$0xff]   ;;  %v5076_v49 = vld [vmem:[%s5835_s2 + $0x78] sm:$0xff] }
 0x464   :  { %v1171_v54 = vpack.c.bf16 %v1165_v1, %v1166_v47  ;;  %v1173_v55 = vpack.c.bf16 %v1170_v50, %v1169_v48  ;;  %5960 = vst [vmem:[#allocation11_spill] sm:$0xff] %v5069_v45  ;;  %5961 = vst [vmem:[#allocation12_spill] sm:$0xff] %v5076_v49 }
 0x466   :  { %1400 = vmatmul.mubr.bf16.vlgmr.msra.gmra.mxu0 %v1171_v54  ;;  %3982 = vmatmul.mubr.bf16.vlgmr.msra.gmra.mxu1 %v1173_v55 }
 0x467   :  { %3582 = vmatpush3.bf16.msra.mxu0 %v4995_v51  ;;  %3986 = vmatpush3.bf16.msra.mxu1 %v4997_v28 }
 0x468   :  { %3583 = vmatprep.subr.bf16.mxu0 %v4999_v6  ;;  %3987 = vmatprep.subr.bf16.mxu1 %v5948_v22 }
 0x469   :  { %4001 = vmatprep.mubr.msk.bf16.mxu1 %vm4462_vm0, %v5948_v22 }
 0x46b   :  { %3584 = vmatpush3.bf16.msra.mxu0 %v5003_v7  ;;  %3988 = vmatpush3.bf16.msra.mxu1 %v5005_v9 }
 0x46c   :  { %3585 = vmatprep.subr.bf16.mxu0 %v5009_v10  ;;  %3989 = vmatprep.subr.bf16.mxu1 %v5948_v22 }
 0x46f   :  { %3586 = vmatpush3.bf16.msra.mxu0 %v5015_v11  ;;  %3990 = vmatpush3.bf16.msra.mxu1 %v5017_v12 }
 0x470   :  { %3587 = vmatprep.subr.bf16.mxu0 %v5021_v13  ;;  %3991 = vmatprep.subr.bf16.mxu1 %v5948_v22 }
 0x473   :  { %3588 = vmatpush3.bf16.msra.mxu0 %v5027_v14  ;;  %3992 = vmatpush3.bf16.msra.mxu1 %v5029_v15 }
 0x474   :  { %3993 = vmatprep.subr.bf16.mxu1 %v5948_v22  ;;  %3589 = vmatprep.subr.bf16.mxu0 %v5033_v17 }
 0x477   :  { %3590 = vmatpush3.bf16.msra.mxu0 %v5035_v18  ;;  %3994 = vmatpush3.bf16.msra.mxu1 %v5039_v19 }
 0x478   :  { %3995 = vmatprep.subr.bf16.mxu1 %v5948_v22  ;;  %3591 = vmatprep.subr.bf16.mxu0 %v5043_v20 }
 0x47b   :  { %3592 = vmatpush3.bf16.msra.mxu0 %v5045_v38  ;;  %3996 = vmatpush3.bf16.msra.mxu1 %v5049_v23 }
 0x47c   :  { %3997 = vmatprep.subr.bf16.mxu1 %v5948_v22  ;;  %3593 = vmatprep.subr.bf16.mxu0 %v5053_v0 }
 0x47f   :  { %3594 = vmatpush3.bf16.msra.mxu0 %v5055_v29  ;;  %3998 = vmatpush3.bf16.msra.mxu1 %v5059_v30 }
 0x480   :  { %3999 = vmatprep.subr.bf16.mxu1 %v5948_v22  ;;  %3595 = vmatprep.subr.bf16.mxu0 %v5063_v40 }
 0x483   :  { %3596 = vmatpush3.bf16.msra.mxu0 %v5065_v43  ;;  %4000 = vmatpush3.bf16.msra.mxu1 %v5069_v45  ;;  %v5083_v45 = vld [vmem:[%s5836_s3 + $0x30] sm:$0xff] }
 0x484   :  { %4005 = vmatprep.subr.mxu0 %v5076_v49  ;;  %5962 = vst [vmem:[#allocation13_spill] sm:$0xff] %v5083_v45 }
 0x526   :  { %v3566_v62 = vpop.f32.mrf.mxu0  ;;  %v1442_v46 = vpop.f32.mrf.mxu1 }
 0x528   :  { %v3567_v56 = vpop.f32.mrf.mxu0  ;;  %v3983_v1 = vpop.f32.mrf.mxu1 }
 0x529   :  { %v3568_v47 = vadd.f32 %v3567_v56, %v3566_v62  ;;  %v5089_v62 = vld [vmem:[%s5836_s3 + $0x38] sm:$0xff] }
 0x52a   :  { %v3569_v48 = vpop.f32.mrf.mxu0  ;;  %v1445_v50 = vpop.f32.mrf.mxu1  ;;  %5963 = vst [vmem:[#allocation14_spill] sm:$0xff] %v5089_v62 }
 0x52b   :  { %v1443_v54 = vadd.f32 %v3568_v47, %v1442_v46 }
 0x52c   :  { %v3570_v55 = vpop.f32.mrf.mxu0  ;;  %v3984_v40 = vpop.f32.mrf.mxu1 }
 0x52d   :  { %v1449_v43 = vmul.f32 %v1443_v54, %v4638_v8  ;;  %v3571_v30 = vadd.f32 %v3570_v55, %v3569_v48  ;;  %v5104_v55 = vld [vmem:[%s5835_s2 + $0x70] sm:$0xff] }
 0x52e   :  { %5964 = vst [vmem:[#allocation15_spill] sm:$0xff] %v5104_v55 }
 0x52f   :  { %v1446_v29 = vadd.f32 %v3571_v30, %v1445_v50  ;;  %v1454_v0 = vadd.f32 %v5083_v45, %v1449_v43 }
 0x531   :  { %v1450_v46 = vmul.f32 %v1446_v29, %v4647_v16  ;;  %v1456_v56 = vrot.slane %v1454_v0, 7  ;;  %v1460_v8 = vrot.slane %v1454_v0, 1 }
 0x533   :  { %v1455_v40 = vadd.f32 %v5089_v62, %v1450_v46  ;;  %v5118_v46 = vld [vmem:[%s5835_s2 + $0x60] sm:$0xff] }
 0x534   :  { %5966 = vst [vmem:[#allocation17_spill] sm:$0xff] %v5118_v46 }
 0x535   :  { %v1457_v1 = vrot.slane %v1455_v40, 7  ;;  %v1461_v47 = vrot.slane %v1455_v40, 1  ;;  %v1465_v54 = vpack.c.bf16 %v1455_v40, %v1454_v0  ;;  %v5111_v0 = vld [vmem:[%s5835_s2 + $0x68] sm:$0xff]  ;;  %v5132_v40 = vld [vmem:[%s5835_s2 + $0x50] sm:$0xff] }
 0x536   :  { %5965 = vst [vmem:[#allocation16_spill] sm:$0xff] %v5111_v0  ;;  %5968 = vst [vmem:[#allocation19_spill] sm:$0xff] %v5132_v40 }
 0x537   :  { %1692 = vmatprep.mubr.bf16.mxu0 %v1465_v54  ;;  %v1458_v30 = vsel %vm58_vm2, %v1456_v56, %v1457_v1  ;;  %v1459_v43 = vsel %vm58_vm2, %v1457_v1, %v1456_v56  ;;  %v1462_v48 = vsel %vm63_vm1, %v1460_v8, %v1461_v47  ;;  %v1463_v16 = vsel %vm63_vm1, %v1461_v47, %v1460_v8  ;;  %v5139_v56 = vld [vmem:[%s5835_s2 + $0x48] sm:$0xff]  ;;  %v5146_v8 = vld [vmem:[%s5835_s2 + $0x40] sm:$0xff]  ;;  %v5153_v1 = vld [vmem:[%s5835_s2 + $0x38] sm:$0xff] }
 0x538   :  { %v1464_v29 = vpack.c.bf16 %v1458_v30, %v1459_v43  ;;  %v1466_v50 = vpack.c.bf16 %v1463_v16, %v1462_v48  ;;  %5969 = vst [vmem:[#allocation20_spill] sm:$0xff] %v5139_v56  ;;  %5970 = vst [vmem:[#allocation21_spill] sm:$0xff] %v5146_v8  ;;  %v5160_v47 = vld [vmem:[%s5835_s2 + $0x30] sm:$0xff]  ;;  %v5167_v54 = vld [vmem:[%s5835_s2 + $0x28] sm:$0xff] }
 0x539   :  { %5971 = vst [vmem:[#allocation22_spill] sm:$0xff] %v5153_v1  ;;  %5972 = vst [vmem:[#allocation23_spill] sm:$0xff] %v5160_v47  ;;  %v5174_v30 = vld [vmem:[%s5835_s2 + $0x20] sm:$0xff]  ;;  %v5181_v43 = vld [vmem:[%s5835_s2 + $0x18] sm:$0xff] }
 0x53a   :  { %1693 = vmatmul.mubr.bf16.vlgmr.msra.gmra.mxu0 %v1464_v29  ;;  %4002 = vmatmul.mubr.bf16.vlgmr.msra.gmra.mxu1 %v1466_v50  ;;  %5973 = vst [vmem:[#allocation24_spill] sm:$0xff] %v5167_v54  ;;  %5974 = vst [vmem:[#allocation25_spill] sm:$0xff] %v5174_v30  ;;  %v5188_v48 = vld [vmem:[%s5835_s2 + $0x10] sm:$0xff]  ;;  %v5195_v16 = vld [vmem:[%s5835_s2 + $0x8] sm:$0xff] }
 0x53b   :  { %4006 = vmatpush3.msra.mxu0 %v5076_v49  ;;  %4037 = vmatprep.mubr.f32.mxu0 %v4977_v41  ;;  %v5125_v41 = vld [vmem:[%s5835_s2 + $0x58] sm:$0xff]  ;;  %5975 = vst [vmem:[#allocation26_spill] sm:$0xff] %v5181_v43  ;;  %5976 = vst [vmem:[#allocation27_spill] sm:$0xff] %v5188_v48  ;;  %v5202_v29 = vld [vmem:[%s5835_s2] sm:$0xff] }
 0x53c   :  { %4007 = vmatprep.subr.mxu0 %v5104_v55  ;;  %5967 = vst [vmem:[#allocation18_spill] sm:$0xff] %v5125_v41  ;;  %5977 = vst [vmem:[#allocation28_spill] sm:$0xff] %v5195_v16  ;;  %v5212_v50 = vld [vmem:[#allocation2 + $0x438] sm:$0xff]  }
 0x53d   :  { %4008 = vmatpush3.msra.mxu0 %v5104_v55  ;;  %5978 = vst [vmem:[#allocation29_spill] sm:$0xff] %v5202_v29  ;;  %5979 = vst [vmem:[#allocation30_spill] sm:$0xff] %v5212_v50  ;;  %3630 = vmatprep.subr.bf16.mxu1 %v5212_v50 }
 0x53e   :  { %4009 = vmatprep.subr.mxu0 %v5111_v0 }
 0x53f   :  { %4010 = vmatpush3.msra.mxu0 %v5111_v0 }
 0x540   :  { %4011 = vmatprep.subr.mxu0 %v5118_v46 }
 0x541   :  { %4012 = vmatpush3.msra.mxu0 %v5118_v46 }
 0x542   :  { %4013 = vmatprep.subr.mxu0 %v5125_v41 }
 0x543   :  { %4014 = vmatpush3.msra.mxu0 %v5125_v41 }
 0x544   :  { %4015 = vmatprep.subr.mxu0 %v5132_v40 }
 0x545   :  { %4016 = vmatpush3.msra.mxu0 %v5132_v40 }
 0x546   :  { %4017 = vmatprep.subr.mxu0 %v5139_v56 }
 0x547   :  { %4018 = vmatpush3.msra.mxu0 %v5139_v56  ;;  %v5257_v56 = vld [vmem:[#allocation2 + $0x458] sm:$0xff]  }
 0x548   :  { %4019 = vmatprep.subr.mxu0 %v5146_v8  ;;  %5993 = vst [vmem:[#allocation44_spill] sm:$0xff] %v5257_v56 }
 0x549   :  { %4020 = vmatpush3.msra.mxu0 %v5146_v8  ;;  %v5249_v8 = vld [vmem:[#allocation2 + $0x418] sm:$0xff]  }
 0x54a   :  { %4021 = vmatprep.subr.mxu0 %v5153_v1  ;;  %5991 = vst [vmem:[#allocation42_spill] sm:$0xff] %v5249_v8 }
 0x54b   :  { %4022 = vmatpush3.msra.mxu0 %v5153_v1  ;;  %v5242_v1 = vld [vmem:[#allocation2 + $0x460] sm:$0xff]  }
 0x54c   :  { %4023 = vmatprep.subr.mxu0 %v5160_v47  ;;  %5989 = vst [vmem:[#allocation40_spill] sm:$0xff] %v5242_v1 }
 0x54d   :  { %4024 = vmatpush3.msra.mxu0 %v5160_v47  ;;  %v5239_v47 = vld [vmem:[#allocation2 + $0x420] sm:$0xff]  }
 0x54e   :  { %4025 = vmatprep.subr.mxu0 %v5167_v54  ;;  %5988 = vst [vmem:[#allocation39_spill] sm:$0xff] %v5239_v47 }
 0x54f   :  { %4026 = vmatpush3.msra.mxu0 %v5167_v54  ;;  %v5232_v54 = vld [vmem:[#allocation2 + $0x468] sm:$0xff]  }
 0x550   :  { %4027 = vmatprep.subr.mxu0 %v5174_v30  ;;  %5986 = vst [vmem:[#allocation37_spill] sm:$0xff] %v5232_v54 }
 0x551   :  { %4028 = vmatpush3.msra.mxu0 %v5174_v30  ;;  %v5218_v30 = vld [vmem:[#allocation2 + $0x430] sm:$0xff]  }
 0x552   :  { %4029 = vmatprep.subr.mxu0 %v5181_v43  ;;  %5982 = vst [vmem:[#allocation33_spill] sm:$0xff] %v5218_v30 }
 0x553   :  { %4030 = vmatpush3.msra.mxu0 %v5181_v43  ;;  %v5216_v43 = vld [vmem:[#allocation2 + $0x478] sm:$0xff]  }
 0x554   :  { %4031 = vmatprep.subr.mxu0 %v5188_v48  ;;  %5981 = vst [vmem:[#allocation32_spill] sm:$0xff] %v5216_v43 }
 0x555   :  { %4032 = vmatpush3.msra.mxu0 %v5188_v48  ;;  %v5214_v48 = vld [vmem:[#allocation2 + $0x3f8] sm:$0xff]  }
 0x556   :  { %4033 = vmatprep.subr.mxu0 %v5195_v16  ;;  %5980 = vst [vmem:[#allocation31_spill] sm:$0xff] %v5214_v48  ;;  %3631 = vmatpush3.bf16.msra.mxu1 %v5214_v48 }
 0x557   :  { %4034 = vmatpush3.msra.mxu0 %v5195_v16  ;;  %3632 = vmatprep.subr.bf16.mxu1 %v5218_v30  ;;  %v5229_v16 = vld [vmem:[#allocation2 + $0x428] sm:$0xff]  }
 0x558   :  { %4035 = vmatprep.subr.mxu0 %v5202_v29  ;;  %5985 = vst [vmem:[#allocation36_spill] sm:$0xff] %v5229_v16 }
 0x559   :  { %4036 = vmatpush3.msra.mxu0 %v5202_v29  ;;  %v5222_v29 = vld [vmem:[#allocation2 + $0x470] sm:$0xff]  }
 0x55a   :  { %4038 = vmatmul.mubr.f32.vlgmr.msra.gmra.mxu0 %v4979_v44  ;;  %4040 = vmatprep.subr.bf16.mxu0 %v5948_v22  ;;  %5983 = vst [vmem:[#allocation34_spill] sm:$0xff] %v5222_v29  ;;  %v5226_v44 = vld [vmem:[#allocation2 + $0x3f0] sm:$0xff]  }
 0x55b   :  { %4056 = vmatprep.mubr.msk.bf16.mxu0 %vm4462_vm0, %v5948_v22  ;;  %4041 = vmatpush3.bf16.msra.mxu0 %v5216_v43  ;;  %5984 = vst [vmem:[#allocation35_spill] sm:$0xff] %v5226_v44  ;;  %v5236_v43 = vld [vmem:[#allocation2 + $0x3e8] sm:$0xff]  }
 0x55c   :  { %4042 = vmatprep.subr.bf16.mxu0 %v5948_v22  ;;  %3633 = vmatpush3.bf16.msra.mxu1 %v5226_v44  ;;  %5987 = vst [vmem:[#allocation38_spill] sm:$0xff] %v5236_v43 }
 0x55d   :  { %3634 = vmatprep.subr.bf16.mxu1 %v5229_v16 }
 0x55f   :  { %4043 = vmatpush3.bf16.msra.mxu0 %v5222_v29  ;;  %v5246_v29 = vld [vmem:[#allocation2 + $0x3e0] sm:$0xff]  }
 0x560   :  { %4044 = vmatprep.subr.bf16.mxu0 %v5948_v22  ;;  %3635 = vmatpush3.bf16.msra.mxu1 %v5236_v43  ;;  %5990 = vst [vmem:[#allocation41_spill] sm:$0xff] %v5246_v29  ;;  %v5261_v43 = vld [vmem:[#allocation2 + $0x410] sm:$0xff]  }
 0x561   :  { %3636 = vmatprep.subr.bf16.mxu1 %v5239_v47  ;;  %5994 = vst [vmem:[#allocation45_spill] sm:$0xff] %v5261_v43  ;;  %v5264_v47 = vld [vmem:[#allocation2 + $0x3d0] sm:$0xff]  }
 0x562   :  { %5995 = vst [vmem:[#allocation46_spill] sm:$0xff] %v5264_v47 }
 0x563   :  { %4045 = vmatpush3.bf16.msra.mxu0 %v5232_v54  ;;  %v5255_v54 = vld [vmem:[#allocation2 + $0x3d8] sm:$0xff]  }
 0x564   :  { %4046 = vmatprep.subr.bf16.mxu0 %v5948_v22  ;;  %3637 = vmatpush3.bf16.msra.mxu1 %v5246_v29  ;;  %5992 = vst [vmem:[#allocation43_spill] sm:$0xff] %v5255_v54  ;;  %v5281_v29 = vld [vmem:[#allocation2 + $0x400] sm:$0xff]  }
 0x565   :  { %3638 = vmatprep.subr.bf16.mxu1 %v5249_v8  ;;  %v5271_v8 = vld [vmem:[#allocation2 + $0x408] sm:$0xff]   ;;  %6000 = vst [vmem:[#allocation51_spill] sm:$0xff] %v5281_v29 }
 0x566   :  { %5997 = vst [vmem:[#allocation48_spill] sm:$0xff] %v5271_v8 }
 0x567   :  { %4047 = vmatpush3.bf16.msra.mxu0 %v5242_v1  ;;  %v5266_v1 = vld [vmem:[#allocation2 + $0x450] sm:$0xff]  }
 0x568   :  { %4048 = vmatprep.subr.bf16.mxu0 %v5948_v22  ;;  %3639 = vmatpush3.bf16.msra.mxu1 %v5255_v54  ;;  %5996 = vst [vmem:[#allocation47_spill] sm:$0xff] %v5266_v1  ;;  %v5274_v54 = vld [vmem:[#allocation2 + $0x3c8] sm:$0xff]  }
 0x569   :  { %3640 = vmatprep.subr.bf16.mxu1 %v5261_v43  ;;  %5998 = vst [vmem:[#allocation49_spill] sm:$0xff] %v5274_v54 }
 0x56b   :  { %4049 = vmatpush3.bf16.msra.mxu0 %v5257_v56  ;;  %v5276_v56 = vld [vmem:[#allocation2 + $0x448] sm:$0xff]  }
 0x56c   :  { %4050 = vmatprep.subr.bf16.mxu0 %v5948_v22  ;;  %3641 = vmatpush3.bf16.msra.mxu1 %v5264_v47  ;;  %5999 = vst [vmem:[#allocation50_spill] sm:$0xff] %v5276_v56  ;;  %v5284_v47 = vld [vmem:[#allocation2 + $0x3c0] sm:$0xff]  }
 0x56d   :  { %3642 = vmatprep.subr.bf16.mxu1 %v5271_v8  ;;  %6001 = vst [vmem:[#allocation52_spill] sm:$0xff] %v5284_v47  ;;  %v5292_v8 = vld [vmem:[#allocation2 + $0x4f8] sm:$0xff]  }
 0x56e   :  { %6003 = vst [vmem:[#allocation54_spill] sm:$0xff] %v5292_v8 }
 0x56f   :  { %4051 = vmatpush3.bf16.msra.mxu0 %v5266_v1  ;;  %v5286_v1 = vld [vmem:[#allocation2 + $0x440] sm:$0xff]  }
 0x570   :  { %4052 = vmatprep.subr.bf16.mxu0 %v5948_v22  ;;  %3643 = vmatpush3.bf16.msra.mxu1 %v5274_v54  ;;  %6002 = vst [vmem:[#allocation53_spill] sm:$0xff] %v5286_v1 }
 0x571   :  { %3644 = vmatprep.subr.bf16.mxu1 %v5281_v29 }
 0x573   :  { %4053 = vmatpush3.bf16.msra.mxu0 %v5276_v56 }
 0x574   :  { %4054 = vmatprep.subr.bf16.mxu0 %v5948_v22  ;;  %3645 = vmatpush3.bf16.msra.mxu1 %v5284_v47 }
 0x575   :  { %3661 = vmatprep.subr.bf16.mxu1 %v5292_v8 }
 0x577   :  { %4055 = vmatpush3.bf16.msra.mxu0 %v5286_v1  ;;  %v5298_v1 = vld [vmem:[%s5837_s4 + $0x8] sm:$0xff] }
 0x578   :  { %4060 = vmatprep.subr.bf16.mxu0 %v5948_v22 }
 0x5fa   :  { %v3597_v56 = vpop.f32.mrf.mxu0  ;;  %v1735_v54 = vpop.f32.mrf.mxu1 }
 0x5fc   :  { %v4003_v43 = vpop.f32.mrf.mxu1  ;;  %v3598_v40 = vpop.f32.mrf.mxu0 }
 0x5fd   :  { %v3599_v29 = vadd.f32 %v3598_v40, %v3597_v56  ;;  %v5304_v43 = vld [vmem:[%s5836_s3 + $0x48] sm:$0xff] }
 0x5fe   :  { %v1738_v41 = vpop.f32.mrf.mxu1  ;;  %v3600_v44 = vpop.f32.mrf.mxu0  ;;  %6004 = vst [vmem:[#allocation55_spill] sm:$0xff] %v5304_v43 }
 0x5ff   :  { %v1736_v47 = vadd.f32 %v3599_v29, %v1735_v54  ;;  %v5322_v54 = vld [vmem:[%s5836_s3 + $0x78] sm:$0xff] }
 0x600   :  { %v4004_v16 = vpop.f32.mrf.mxu1  ;;  %v3601_v46 = vpop.f32.mrf.mxu0 }
 0x601   :  { %v3602_v0 = vadd.f32 %v3601_v46, %v3600_v44  ;;  %v5309_v16 = vld [vmem:[%s5837_s4] sm:$0xff] }
 0x602   :  { %v5315_v46 = vld [vmem:[%s5836_s3 + $0x40] sm:$0xff] }
 0x603   :  { %v1739_v30 = vadd.f32 %v3602_v0, %v1738_v41  ;;  %v1742_v0 = vmul.f32 %v5309_v16, %v1736_v47  ;;  %6005 = vst [vmem:[#allocation56_spill] sm:$0xff] %v5315_v46  ;;  %v5327_v47 = vld [vmem:[%s5836_s3 + $0x70] sm:$0xff] }
 0x605   :  { %v1743_v48 = vmul.f32 %v5298_v1, %v1739_v30  ;;  %v1747_v40 = vadd.f32 %v5315_v46, %v1742_v0 }
 0x607   :  { %v1748_v41 = vadd.f32 %v5304_v43, %v1743_v48  ;;  %v1751_v29 = vmul.f32 0.1, %v1747_v40  ;;  %vm1749_vm14 = vcmp.ge.f32.partialorder %v1747_v40, 0.0 }
 0x609   :  { %v1752_v56 = vmul.f32 0.1, %v1748_v41  ;;  %vm1750_vm13 = vcmp.ge.f32.partialorder %v1748_v41, 0.0  ;;  %v1753_v8 = vsel %vm1749_vm14, %v1747_v40, %v1751_v29  ;;  %v5351_v40 = vld [vmem:[#allocation2 + $0x538] sm:$0xff]   ;;  %vm2949_vm14 = vcmask 130048  }
 0x60a   :  { %6007 = vst [vmem:[#allocation58_spill] sm:$0xff] %v5351_v40 }
 0x60b   :  { %v1754_v48 = vsel %vm1750_vm13, %v1748_v41, %v1752_v56 }
 0x61a   :  { %v4039_v30 = vpop.f32.mrf.mxu0 }
 0x61b   :  { %v1846_v44 = vadd.f32 %v4039_v30, %v5322_v54 }
 0x61c   :  { %v1840_v43 = vpop.f32.mrf.mxu0 }
 0x61d   :  { %v1850_v0 = vadd.f32 %v1846_v44, %v1754_v48  ;;  %v1841_v46 = vadd.f32 %v5327_v47, %v1840_v43  ;;  %v5353_v48 = vld [vmem:[#allocation2 + $0x4f0] sm:$0xff]  }
 0x61e   :  { %6008 = vst [vmem:[#allocation59_spill] sm:$0xff] %v5353_v48 }
 0x61f   :  { %vm1852_vm15 = vcmp.ge.f32.partialorder %v1850_v0, 0.0  ;;  %v1854_v55 = vmul.f32 0.1, %v1850_v0  ;;  %v1849_v62 = vadd.f32 %v1841_v46, %v1753_v8  ;;  %v5349_v46 = vld [vmem:[#allocation2 + $0x4b8] sm:$0xff]  }
 0x620   :  { %6006 = vst [vmem:[#allocation57_spill] sm:$0xff] %v5349_v46 }
 0x621   :  { %v5331_v45 = vsel %vm1852_vm15, %v1850_v0, %v1854_v55  ;;  %vm1851_vm3 = vcmp.ge.f32.partialorder %v1849_v62, 0.0  ;;  %v1853_v50 = vmul.f32 0.1, %v1849_v62  ;;  %v5359_v0 = vld [vmem:[#allocation2 + $0x530] sm:$0xff]   ;;  %vm3130_vm15 = vcmask 654336  }
 0x622   :  { %v1858_v49 = vrot.slane %v5331_v45, 7  ;;  %v1862_v30 = vrot.slane %v5331_v45, 1  ;;  %6010 = vst [vmem:[#allocation61_spill] sm:$0xff] %v5359_v0 }
 0x623   :  { %v5334_v23 = vsel %vm1851_vm3, %v1849_v62, %v1853_v50  ;;  %vm3204_vm3 = vcmask 155648  }
 0x624   :  { %v1857_v41 = vrot.slane %v5334_v23, 7  ;;  %v1861_v56 = vrot.slane %v5334_v23, 1  ;;  %v1866_v43 = vpack.c.bf16 %v5331_v45, %v5334_v23 }
 0x626   :  { %2093 = vmatprep.mubr.bf16.mxu1 %v1866_v43  ;;  %v1859_v55 = vsel %vm58_vm2, %v1857_v41, %v1858_v49  ;;  %v1860_v8 = vsel %vm58_vm2, %v1858_v49, %v1857_v41  ;;  %v1863_v62 = vsel %vm63_vm1, %v1861_v56, %v1862_v30  ;;  %v1864_v50 = vsel %vm63_vm1, %v1862_v30, %v1861_v56  ;;  %v5357_v49 = vld [vmem:[#allocation2 + $0x4b0] sm:$0xff]   ;;  %v5363_v30 = vld [vmem:[#allocation2 + $0x4e8] sm:$0xff]   ;;  %v5377_v43 = vld [vmem:[#allocation2 + $0x4e0] sm:$0xff]  }
 0x627   :  { %v1865_v29 = vpack.c.bf16 %v1859_v55, %v1860_v8  ;;  %v1867_v44 = vpack.c.bf16 %v1864_v50, %v1863_v62  ;;  %6009 = vst [vmem:[#allocation60_spill] sm:$0xff] %v5357_v49  ;;  %6011 = vst [vmem:[#allocation62_spill] sm:$0xff] %v5363_v30  ;;  %v5371_v41 = vld [vmem:[#allocation2 + $0x4a8] sm:$0xff]   ;;  %v5380_v55 = vld [vmem:[#allocation2 + $0x4a0] sm:$0xff]  }
 0x628   :  { %6012 = vst [vmem:[#allocation63_spill] sm:$0xff] %v5371_v41  ;;  %v5373_v56 = vld [vmem:[#allocation2 + $0x528] sm:$0xff]   ;;  %6014 = vst [vmem:[#allocation65_spill] sm:$0xff] %v5377_v43  ;;  %v5382_v8 = vld [vmem:[#allocation2 + $0x520] sm:$0xff]  }
 0x629   :  { %2094 = vmatmul.mubr.bf16.vlgmr.msra.gmra.mxu1 %v1865_v29  ;;  %4057 = vmatmul.mubr.bf16.vlgmr.msra.gmra.mxu0 %v1867_v44  ;;  %6013 = vst [vmem:[#allocation64_spill] sm:$0xff] %v5373_v56  ;;  %6015 = vst [vmem:[#allocation66_spill] sm:$0xff] %v5380_v55  ;;  %v5387_v62 = vld [vmem:[#allocation2 + $0x4d8] sm:$0xff]   ;;  %v5397_v44 = vld [vmem:[#allocation2 + $0x4d0] sm:$0xff]  }
 0x62a   :  { %3662 = vmatpush3.bf16.msra.mxu1 %v5349_v46  ;;  %4061 = vmatpush3.bf16.msra.mxu0 %v5351_v40  ;;  %6016 = vst [vmem:[#allocation67_spill] sm:$0xff] %v5382_v8  ;;  %6017 = vst [vmem:[#allocation68_spill] sm:$0xff] %v5387_v62  ;;  %v5390_v50 = vld [vmem:[#allocation2 + $0x498] sm:$0xff]  }
 0x62b   :  { %3663 = vmatprep.subr.bf16.mxu1 %v5353_v48  ;;  %4062 = vmatprep.subr.bf16.mxu0 %v5948_v22  ;;  %6018 = vst [vmem:[#allocation69_spill] sm:$0xff] %v5390_v50  ;;  %v5392_v29 = vld [vmem:[#allocation2 + $0x518] sm:$0xff]   ;;  %6020 = vst [vmem:[#allocation71_spill] sm:$0xff] %v5397_v44 }
 0x62c   :  { %4076 = vmatprep.mubr.msk.bf16.mxu0 %vm4462_vm0, %v5948_v22  ;;  %6019 = vst [vmem:[#allocation70_spill] sm:$0xff] %v5392_v29 }
 0x62e   :  { %3664 = vmatpush3.bf16.msra.mxu1 %v5357_v49  ;;  %4063 = vmatpush3.bf16.msra.mxu0 %v5359_v0  ;;  %v5432_v0 = vld [vmem:[%s5836_s3 + $0x50] sm:$0xff] }
 0x62f   :  { %3665 = vmatprep.subr.bf16.mxu1 %v5363_v30  ;;  %4064 = vmatprep.subr.bf16.mxu0 %v5948_v22  ;;  %6029 = vst [vmem:[#allocation80_spill] sm:$0xff] %v5432_v0 }
 0x632   :  { %3666 = vmatpush3.bf16.msra.mxu1 %v5371_v41  ;;  %4065 = vmatpush3.bf16.msra.mxu0 %v5373_v56 }
 0x633   :  { %4066 = vmatprep.subr.bf16.mxu0 %v5948_v22  ;;  %3667 = vmatprep.subr.bf16.mxu1 %v5377_v43  ;;  %v5407_v43 = vld [vmem:[#allocation2 + $0x4c8] sm:$0xff]  }
 0x634   :  { %6023 = vst [vmem:[#allocation74_spill] sm:$0xff] %v5407_v43 }
 0x636   :  { %3668 = vmatpush3.bf16.msra.mxu1 %v5380_v55  ;;  %4067 = vmatpush3.bf16.msra.mxu0 %v5382_v8  ;;  %v5400_v55 = vld [vmem:[#allocation2 + $0x490] sm:$0xff]  }
 0x637   :  { %4068 = vmatprep.subr.bf16.mxu0 %v5948_v22  ;;  %3669 = vmatprep.subr.bf16.mxu1 %v5387_v62  ;;  %6021 = vst [vmem:[#allocation72_spill] sm:$0xff] %v5400_v55  ;;  %v5402_v8 = vld [vmem:[#allocation2 + $0x510] sm:$0xff]   ;;  %v5414_v62 = vld [vmem:[#allocation2 + $0x4c0] sm:$0xff]  }
 0x638   :  { %6022 = vst [vmem:[#allocation73_spill] sm:$0xff] %v5402_v8  ;;  %6026 = vst [vmem:[#allocation77_spill] sm:$0xff] %v5414_v62 }
 0x63a   :  { %3670 = vmatpush3.bf16.msra.mxu1 %v5390_v50  ;;  %4069 = vmatpush3.bf16.msra.mxu0 %v5392_v29  ;;  %v5410_v50 = vld [vmem:[#allocation2 + $0x488] sm:$0xff]  }
 0x63b   :  { %4070 = vmatprep.subr.bf16.mxu0 %v5948_v22  ;;  %3671 = vmatprep.subr.bf16.mxu1 %v5397_v44  ;;  %6024 = vst [vmem:[#allocation75_spill] sm:$0xff] %v5410_v50  ;;  %v5412_v29 = vld [vmem:[#allocation2 + $0x508] sm:$0xff]   ;;  %v5419_v44 = vld [vmem:[#allocation2 + $0x480] sm:$0xff]  }
 0x63c   :  { %6025 = vst [vmem:[#allocation76_spill] sm:$0xff] %v5412_v29  ;;  %6027 = vst [vmem:[#allocation78_spill] sm:$0xff] %v5419_v44 }
 0x63e   :  { %3672 = vmatpush3.bf16.msra.mxu1 %v5400_v55  ;;  %4071 = vmatpush3.bf16.msra.mxu0 %v5402_v8  ;;  %v5423_v8 = vld [vmem:[#allocation2 + $0x500] sm:$0xff]  }
 0x63f   :  { %4072 = vmatprep.subr.bf16.mxu0 %v5948_v22  ;;  %3673 = vmatprep.subr.bf16.mxu1 %v5407_v43  ;;  %6028 = vst [vmem:[#allocation79_spill] sm:$0xff] %v5423_v8 }
 0x642   :  { %3674 = vmatpush3.bf16.msra.mxu1 %v5410_v50  ;;  %4073 = vmatpush3.bf16.msra.mxu0 %v5412_v29 }
 0x643   :  { %3675 = vmatprep.subr.bf16.mxu1 %v5414_v62  ;;  %4074 = vmatprep.subr.bf16.mxu0 %v5948_v22 }
 0x646   :  { %3676 = vmatpush3.bf16.msra.mxu1 %v5419_v44  ;;  %4075 = vmatpush3.bf16.msra.mxu0 %v5423_v8 }
 0x647   :  { %3692 = vmatprep.subr.bf16.mxu1 %v4874_v4  ;;  %4080 = vmatprep.subr.bf16.mxu0 %v5948_v22 }
 0x6e9   :  { %v3646_v43 = vpop.f32.mrf.mxu1  ;;  %v2136_v50 = vpop.f32.mrf.mxu0 }
 0x6eb   :  { %v3647_v55 = vpop.f32.mrf.mxu1  ;;  %v4058_v29 = vpop.f32.mrf.mxu0 }
 0x6ec   :  { %v3648_v56 = vadd.f32 %v3647_v55, %v3646_v43  ;;  %v5439_v43 = vld [vmem:[%s5836_s3 + $0x58] sm:$0xff] }
 0x6ed   :  { %v3649_v41 = vpop.f32.mrf.mxu1  ;;  %v2139_v30 = vpop.f32.mrf.mxu0 }
 0x6ee   :  { %v2137_v62 = vadd.f32 %v3648_v56, %v2136_v50 }
 0x6ef   :  { %v3650_v44 = vpop.f32.mrf.mxu1  ;;  %v4059_v49 = vpop.f32.mrf.mxu0 }
 0x6f0   :  { %v2143_v8 = vmul.f32 %v5309_v16, %v2137_v62  ;;  %v3651_v4 = vadd.f32 %v3650_v44, %v3649_v41 }
 0x6f2   :  { %v2148_v48 = vadd.f32 %v5432_v0, %v2143_v8  ;;  %v2140_v40 = vadd.f32 %v3651_v4, %v2139_v30 }
 0x6f4   :  { %v2144_v56 = vmul.f32 %v5298_v1, %v2140_v40  ;;  %vm2150_vm4 = vcmp.ge.f32.partialorder %v2148_v48, 0.0  ;;  %v2152_v55 = vmul.f32 0.1, %v2148_v48 }
 0x6f6   :  { %v2149_v50 = vadd.f32 %v5439_v43, %v2144_v56  ;;  %v2154_v29 = vsel %vm2150_vm4, %v2148_v48, %v2152_v55 }
 0x6f7   :  { %v2156_v62 = vrot.slane %v2154_v29, 7  ;;  %v2160_v44 = vrot.slane %v2154_v29, 1 }
 0x6f8   :  { %vm2151_vm5 = vcmp.ge.f32.partialorder %v2149_v50, 0.0  ;;  %v2153_v49 = vmul.f32 0.1, %v2149_v50 }
 0x6fa   :  { %v2155_v46 = vsel %vm2151_vm5, %v2149_v50, %v2153_v49 }
 0x6fb   :  { %v2157_v41 = vrot.slane %v2155_v46, 7  ;;  %v2161_v8 = vrot.slane %v2155_v46, 1  ;;  %v2165_v30 = vpack.c.bf16 %v2155_v46, %v2154_v29 }
 0x6fd   :  { %2392 = vmatprep.mubr.bf16.mxu1 %v2165_v30  ;;  %v2158_v4 = vsel %vm58_vm2, %v2156_v62, %v2157_v41  ;;  %v2159_v40 = vsel %vm58_vm2, %v2157_v41, %v2156_v62  ;;  %v2162_v0 = vsel %vm63_vm1, %v2160_v44, %v2161_v8  ;;  %v2163_v48 = vsel %vm63_vm1, %v2161_v8, %v2160_v44 }
 0x6fe   :  { %v2164_v56 = vpack.c.bf16 %v2158_v4, %v2159_v40  ;;  %v2166_v55 = vpack.c.bf16 %v2163_v48, %v2162_v0 }
 0x700   :  { %2393 = vmatmul.mubr.bf16.vlgmr.msra.gmra.mxu1 %v2164_v56  ;;  %4077 = vmatmul.mubr.bf16.vlgmr.msra.gmra.mxu0 %v2166_v55 }
 0x701   :  { %3693 = vmatpush3.bf16.msra.mxu1 %v4889_v52  ;;  %4081 = vmatpush3.bf16.msra.mxu0 %v4891_v53 }
 0x702   :  { %3694 = vmatprep.subr.bf16.mxu1 %v4893_v57  ;;  %4082 = vmatprep.subr.bf16.mxu0 %v5948_v22 }
 0x703   :  { %4096 = vmatprep.mubr.msk.bf16.mxu0 %vm4462_vm0, %v5948_v22 }
 0x705   :  { %3695 = vmatpush3.bf16.msra.mxu1 %v4897_v58  ;;  %4083 = vmatpush3.bf16.msra.mxu0 %v4899_v59 }
 0x706   :  { %3696 = vmatprep.subr.bf16.mxu1 %v4908_v60  ;;  %4084 = vmatprep.subr.bf16.mxu0 %v5948_v22 }
 0x709   :  { %3697 = vmatpush3.bf16.msra.mxu1 %v4910_v61  ;;  %4085 = vmatpush3.bf16.msra.mxu0 %v4912_v63 }
 0x70a   :  { %3698 = vmatprep.subr.bf16.mxu1 %v4917_v39  ;;  %4086 = vmatprep.subr.bf16.mxu0 %v5948_v22  ;;  %v5488_v39 = vld [vmem:[%s5836_s3 + $0x60] sm:$0xff] }
 0x70d   :  { %3699 = vmatpush3.bf16.msra.mxu1 %v4920_v31  ;;  %4087 = vmatpush3.bf16.msra.mxu0 %v4922_v24 }
 0x70e   :  { %3700 = vmatprep.subr.bf16.mxu1 %v4927_v32  ;;  %4088 = vmatprep.subr.bf16.mxu0 %v5948_v22 }
 0x711   :  { %3701 = vmatpush3.bf16.msra.mxu1 %v4930_v25  ;;  %4089 = vmatpush3.bf16.msra.mxu0 %v4932_v26 }
 0x712   :  { %3702 = vmatprep.subr.bf16.mxu1 %v4937_v35  ;;  %4090 = vmatprep.subr.bf16.mxu0 %v5948_v22 }
 0x715   :  { %3703 = vmatpush3.bf16.msra.mxu1 %v4940_v33  ;;  %4091 = vmatpush3.bf16.msra.mxu0 %v4942_v42  ;;  %v5495_v33 = vld [vmem:[%s5836_s3 + $0x68] sm:$0xff] }
 0x716   :  { %3704 = vmatprep.subr.bf16.mxu1 %v4947_v27  ;;  %4092 = vmatprep.subr.bf16.mxu0 %v5948_v22 }
 0x719   :  { %3705 = vmatpush3.bf16.msra.mxu1 %v4950_v34  ;;  %4093 = vmatpush3.bf16.msra.mxu0 %v4952_v36 }
 0x71a   :  { %3706 = vmatprep.subr.bf16.mxu1 %v4954_v37  ;;  %4094 = vmatprep.subr.bf16.mxu0 %v5948_v22 }
 0x71d   :  { %3707 = vmatpush3.bf16.msra.mxu1 %v4959_v2  ;;  %4095 = vmatpush3.bf16.msra.mxu0 %v4963_v3 }
 0x71e   :  { %3723 = vmatprep.subr.bf16.mxu1 %v4968_v5  ;;  %4100 = vmatprep.subr.bf16.mxu0 %v5948_v22 }
 0x7c0   :  { %v3677_v52 = vpop.f32.mrf.mxu1  ;;  %v2435_v53 = vpop.f32.mrf.mxu0 }
 0x7c2   :  { %v3678_v57 = vpop.f32.mrf.mxu1  ;;  %v4078_v58 = vpop.f32.mrf.mxu0 }
 0x7c3   :  { %v3679_v59 = vadd.f32 %v3678_v57, %v3677_v52  ;;  %v6039_v52 = vld [vmem:[#allocation13_spill] sm:$0xff]  ;;  %v6040_v58 = vld [vmem:[#allocation14_spill] sm:$0xff] }
 0x7c4   :  { %v3680_v60 = vpop.f32.mrf.mxu1  ;;  %v2438_v61 = vpop.f32.mrf.mxu0 }
 0x7c5   :  { %v2436_v63 = vadd.f32 %v3679_v59, %v2435_v53 }
 0x7c6   :  { %v3681_v31 = vpop.f32.mrf.mxu1  ;;  %v4079_v24 = vpop.f32.mrf.mxu0 }
 0x7c7   :  { %v2442_v32 = vmul.f32 %v5309_v16, %v2436_v63  ;;  %v3682_v25 = vadd.f32 %v3681_v31, %v3680_v60 }
 0x7c9   :  { %v2447_v26 = vadd.f32 %v5488_v39, %v2442_v32  ;;  %v2439_v35 = vadd.f32 %v3682_v25, %v2438_v61 }
 0x7cb   :  { %v2449_v42 = vadd.f32 %v2447_v26, %v5334_v23  ;;  %v2443_v27 = vmul.f32 %v5298_v1, %v2439_v35 }
 0x7cd   :  { %v2448_v34 = vadd.f32 %v5495_v33, %v2443_v27  ;;  %vm2451_vm6 = vcmp.ge.f32.partialorder %v2449_v42, 0.0  ;;  %v2453_v36 = vmul.f32 0.1, %v2449_v42 }
 0x7cf   :  { %v2450_v37 = vadd.f32 %v2448_v34, %v5331_v45  ;;  %v5501_v2 = vsel %vm2451_vm6, %v2449_v42, %v2453_v36  ;;  %v6041_v34 = vld [vmem:[#allocation15_spill] sm:$0xff] }
 0x7d0   :  { %v2457_v46 = vrot.slane %v5501_v2, 7  ;;  %v2461_v23 = vrot.slane %v5501_v2, 1  ;;  %v6042_v36 = vld [vmem:[#allocation31_spill] sm:$0xff] }
 0x7d1   :  { %vm2452_vm7 = vcmp.ge.f32.partialorder %v2450_v37, 0.0  ;;  %v2454_v3 = vmul.f32 0.1, %v2450_v37 }
 0x7d3   :  { %v5503_v5 = vsel %vm2452_vm7, %v2450_v37, %v2454_v3  ;;  %v6043_v37 = vld [vmem:[#allocation33_spill] sm:$0xff]  ;;  %v6044_v3 = vld [vmem:[#allocation16_spill] sm:$0xff] }
 0x7d4   :  { %v2458_v0 = vrot.slane %v5503_v5, 7  ;;  %v2462_v50 = vrot.slane %v5503_v5, 1  ;;  %v2466_v29 = vpack.c.bf16 %v5503_v5, %v5501_v2 }
 0x7d6   :  { %2500 = vmatprep.mubr.bf16.mxu1 %v2466_v29  ;;  %v2459_v45 = vsel %vm58_vm2, %v2457_v46, %v2458_v0  ;;  %v2460_v49 = vsel %vm58_vm2, %v2458_v0, %v2457_v46  ;;  %v2463_v62 = vsel %vm63_vm1, %v2461_v23, %v2462_v50  ;;  %v2464_v41 = vsel %vm63_vm1, %v2462_v50, %v2461_v23  ;;  %v6045_v46 = vld [vmem:[#allocation17_spill] sm:$0xff]  ;;  %v6046_v0 = vld [vmem:[#allocation35_spill] sm:$0xff]  ;;  %v6047_v23 = vld [vmem:[#allocation36_spill] sm:$0xff] }
 0x7d7   :  { %v2465_v44 = vpack.c.bf16 %v2459_v45, %v2460_v49  ;;  %v2467_v8 = vpack.c.bf16 %v2464_v41, %v2463_v62  ;;  %v6049_v50 = vld [vmem:[#allocation19_spill] sm:$0xff]  ;;  %v6050_v29 = vld [vmem:[#allocation38_spill] sm:$0xff]  ;;  %v6052_v49 = vld [vmem:[#allocation20_spill] sm:$0xff] }
 0x7d8   :  { %v6051_v45 = vld [vmem:[#allocation39_spill] sm:$0xff]  ;;  %v6053_v62 = vld [vmem:[#allocation21_spill] sm:$0xff] }
 0x7d9   :  { %2501 = vmatmul.mubr.bf16.vlgmr.msra.gmra.mxu1 %v2465_v44  ;;  %4097 = vmatmul.mubr.bf16.vlgmr.msra.gmra.mxu0 %v2467_v8  ;;  %v6054_v41 = vld [vmem:[#allocation41_spill] sm:$0xff]  ;;  %v6055_v44 = vld [vmem:[#allocation42_spill] sm:$0xff] }
 0x7da   :  { %3724 = vmatpush3.bf16.msra.mxu1 %v4995_v51  ;;  %4101 = vmatpush3.bf16.msra.mxu0 %v4997_v28  ;;  %v6030_v51 = vld [vmem:[#allocation5_spill] sm:$0xff]  ;;  %v6031_v28 = vld [vmem:[#allocation6_spill] sm:$0xff] }
 0x7db   :  { %3725 = vmatprep.subr.bf16.mxu1 %v4999_v6  ;;  %4102 = vmatprep.subr.bf16.mxu0 %v5948_v22  ;;  %v6032_v6 = vld [vmem:[#allocation7_spill] sm:$0xff]  ;;  %v6056_v8 = vld [vmem:[#allocation22_spill] sm:$0xff] }
 0x7dc   :  { %4116 = vmatprep.mubr.msk.bf16.mxu0 %vm4462_vm0, %v5948_v22 }
 0x7de   :  { %3726 = vmatpush3.bf16.msra.mxu1 %v5003_v7  ;;  %4103 = vmatpush3.bf16.msra.mxu0 %v5005_v9  ;;  %v6033_v7 = vld [vmem:[#allocation8_spill] sm:$0xff]  ;;  %v6034_v9 = vld [vmem:[#allocation9_spill] sm:$0xff] }
 0x7df   :  { %3727 = vmatprep.subr.bf16.mxu1 %v5009_v10  ;;  %4104 = vmatprep.subr.bf16.mxu0 %v5948_v22  ;;  %v6035_v10 = vld [vmem:[#allocation10_spill] sm:$0xff] }
 0x7e2   :  { %3728 = vmatpush3.bf16.msra.mxu1 %v5015_v11  ;;  %4105 = vmatpush3.bf16.msra.mxu0 %v5017_v12  ;;  %v6036_v11 = vld [vmem:[#allocation11_spill] sm:$0xff]  ;;  %v6037_v12 = vld [vmem:[#allocation12_spill] sm:$0xff] }
 0x7e3   :  { %3729 = vmatprep.subr.bf16.mxu1 %v5021_v13  ;;  %4106 = vmatprep.subr.bf16.mxu0 %v5948_v22  ;;  %v6038_v13 = vld [vmem:[#allocation30_spill] sm:$0xff] }
 0x7e6   :  { %3730 = vmatpush3.bf16.msra.mxu1 %v5027_v14  ;;  %4107 = vmatpush3.bf16.msra.mxu0 %v5029_v15 }
 0x7e7   :  { %3731 = vmatprep.subr.bf16.mxu1 %v5033_v17  ;;  %4108 = vmatprep.subr.bf16.mxu0 %v5948_v22 }
 0x7ea   :  { %3732 = vmatpush3.bf16.msra.mxu1 %v5035_v18  ;;  %4109 = vmatpush3.bf16.msra.mxu0 %v5039_v19 }
 0x7eb   :  { %3733 = vmatprep.subr.bf16.mxu1 %v5043_v20  ;;  %4110 = vmatprep.subr.bf16.mxu0 %v5948_v22 }
 0x7ee   :  { %3734 = vmatpush3.bf16.msra.mxu1 %v5045_v38  ;;  %4111 = vmatpush3.bf16.msra.mxu0 %v6030_v51  ;;  %v6057_v51 = vld [vmem:[#allocation23_spill] sm:$0xff] }
 0x7ef   :  { %3735 = vmatprep.subr.bf16.mxu1 %v6031_v28  ;;  %4112 = vmatprep.subr.bf16.mxu0 %v5948_v22  ;;  %v6058_v28 = vld [vmem:[#allocation43_spill] sm:$0xff] }
 0x7f2   :  { %3736 = vmatpush3.bf16.msra.mxu1 %v6032_v6  ;;  %4113 = vmatpush3.bf16.msra.mxu0 %v6033_v7  ;;  %v6059_v6 = vld [vmem:[#allocation45_spill] sm:$0xff]  ;;  %v6060_v7 = vld [vmem:[#allocation24_spill] sm:$0xff] }
 0x7f3   :  { %3737 = vmatprep.subr.bf16.mxu1 %v6034_v9  ;;  %4114 = vmatprep.subr.bf16.mxu0 %v5948_v22  ;;  %v6061_v9 = vld [vmem:[#allocation25_spill] sm:$0xff] }
 0x7f6   :  { %3738 = vmatpush3.bf16.msra.mxu1 %v6035_v10  ;;  %4115 = vmatpush3.bf16.msra.mxu0 %v6036_v11  ;;  %v6062_v10 = vld [vmem:[#allocation46_spill] sm:$0xff]  ;;  %v6063_v11 = vld [vmem:[#allocation48_spill] sm:$0xff] }
 0x7f7   :  { %4120 = vmatprep.subr.mxu1 %v6037_v12  ;;  %3772 = vmatprep.subr.bf16.mxu0 %v6038_v13  ;;  %v6065_v13 = vld [vmem:[#allocation27_spill] sm:$0xff] }
 0x899   :  { %v3708_v14 = vpop.f32.mrf.mxu1  ;;  %v2543_v15 = vpop.f32.mrf.mxu0 }
 0x89b   :  { %v3709_v17 = vpop.f32.mrf.mxu1  ;;  %v4098_v18 = vpop.f32.mrf.mxu0 }
 0x89c   :  { %v3710_v19 = vadd.f32 %v3709_v17, %v3708_v14  ;;  %v6066_v14 = vld [vmem:[#allocation49_spill] sm:$0xff]  ;;  %v6068_v17 = vld [vmem:[#allocation28_spill] sm:$0xff] }
 0x89d   :  { %v3711_v20 = vpop.f32.mrf.mxu1  ;;  %v2546_v38 = vpop.f32.mrf.mxu0  ;;  %v6069_v18 = vld [vmem:[#allocation29_spill] sm:$0xff] }
 0x89e   :  { %v2544_v30 = vadd.f32 %v3710_v19, %v2543_v15  ;;  %v6067_v15 = vld [vmem:[#allocation51_spill] sm:$0xff]  ;;  %v6070_v19 = vld [vmem:[#allocation52_spill] sm:$0xff] }
 0x89f   :  { %v3712_v4 = vpop.f32.mrf.mxu1  ;;  %v4099_v40 = vpop.f32.mrf.mxu0 }
 0x8a0   :  { %v2550_v48 = vmul.f32 %v5309_v16, %v2544_v30  ;;  %v3713_v56 = vadd.f32 %v3712_v4, %v3711_v20  ;;  %v6071_v20 = vld [vmem:[#allocation54_spill] sm:$0xff]  ;;  %v6074_v4 = vld [vmem:[#allocation37_spill] sm:$0xff]  ;;  %v6075_v40 = vld [vmem:[#allocation40_spill] sm:$0xff] }
 0x8a1   :  { %v6073_v30 = vld [vmem:[#allocation34_spill] sm:$0xff] }
 0x8a2   :  { %v2547_v55 = vadd.f32 %v3713_v56, %v2546_v38  ;;  %v2552_v53 = vadd.f32 %v6039_v52, %v2550_v48  ;;  %v6072_v38 = vld [vmem:[#allocation32_spill] sm:$0xff]  ;;  %v6077_v48 = vld [vmem:[#allocation47_spill] sm:$0xff]  ;;  %v6078_v56 = vld [vmem:[#allocation50_spill] sm:$0xff] }
 0x8a4   :  { %v2551_v57 = vmul.f32 %v5298_v1, %v2547_v55  ;;  %v2554_v60 = vrot.slane %v2552_v53, 7  ;;  %v2558_v61 = vrot.slane %v2552_v53, 1  ;;  %v6079_v55 = vld [vmem:[#allocation53_spill] sm:$0xff] }
 0x8a6   :  { %v2553_v59 = vadd.f32 %v6040_v58, %v2551_v57 }
 0x8a8   :  { %v2555_v63 = vrot.slane %v2553_v59, 7  ;;  %v2559_v31 = vrot.slane %v2553_v59, 1  ;;  %v2563_v24 = vpack.c.bf16 %v2553_v59, %v2552_v53 }
 0x8aa   :  { %2597 = vmatprep.mubr.bf16.mxu1 %v2563_v24  ;;  %v2556_v32 = vsel %vm58_vm2, %v2554_v60, %v2555_v63  ;;  %v2557_v25 = vsel %vm58_vm2, %v2555_v63, %v2554_v60  ;;  %v2560_v26 = vsel %vm63_vm1, %v2558_v61, %v2559_v31  ;;  %v2561_v35 = vsel %vm63_vm1, %v2559_v31, %v2558_v61 }
 0x8ab   :  { %v2562_v42 = vpack.c.bf16 %v2556_v32, %v2557_v25  ;;  %v2564_v27 = vpack.c.bf16 %v2561_v35, %v2560_v26 }
 0x8ad   :  { %2598 = vmatmul.mubr.bf16.vlgmr.msra.gmra.mxu1 %v2562_v42  ;;  %4117 = vmatmul.mubr.bf16.vlgmr.msra.gmra.mxu0 %v2564_v27  ;;  %v6080_v42 = vld [vmem:[#allocation55_spill] sm:$0xff] }
 0x8ae   :  { %4121 = vmatpush3.msra.mxu1 %v6037_v12  ;;  %4152 = vmatprep.mubr.f32.mxu1 %v5501_v2  ;;  %v6048_v2 = vld [vmem:[#allocation18_spill] sm:$0xff] }
 0x8af   :  { %4122 = vmatprep.subr.mxu1 %v6041_v34  ;;  %3773 = vmatpush3.bf16.msra.mxu0 %v6042_v36  ;;  %v6064_v12 = vld [vmem:[#allocation26_spill] sm:$0xff] }
 0x8b0   :  { %4123 = vmatpush3.msra.mxu1 %v6041_v34  ;;  %3774 = vmatprep.subr.bf16.mxu0 %v6043_v37  ;;  %v6081_v34 = vld [vmem:[#allocation56_spill] sm:$0xff] }
 0x8b1   :  { %4124 = vmatprep.subr.mxu1 %v6044_v3 }
 0x8b2   :  { %4125 = vmatpush3.msra.mxu1 %v6044_v3 }
 0x8b3   :  { %4126 = vmatprep.subr.mxu1 %v6045_v46  ;;  %3775 = vmatpush3.bf16.msra.mxu0 %v6046_v0 }
 0x8b4   :  { %4127 = vmatpush3.msra.mxu1 %v6045_v46  ;;  %3776 = vmatprep.subr.bf16.mxu0 %v6047_v23 }
 0x8b5   :  { %4128 = vmatprep.subr.mxu1 %v6048_v2 }
 0x8b6   :  { %4129 = vmatpush3.msra.mxu1 %v6048_v2 }
 0x8b7   :  { %4130 = vmatprep.subr.mxu1 %v6049_v50  ;;  %3777 = vmatpush3.bf16.msra.mxu0 %v6050_v29 }
 0x8b8   :  { %4131 = vmatpush3.msra.mxu1 %v6049_v50  ;;  %3778 = vmatprep.subr.bf16.mxu0 %v6051_v45 }
 0x8b9   :  { %4132 = vmatprep.subr.mxu1 %v6052_v49 }
 0x8ba   :  { %4133 = vmatpush3.msra.mxu1 %v6052_v49 }
 0x8bb   :  { %4134 = vmatprep.subr.mxu1 %v6053_v62  ;;  %3779 = vmatpush3.bf16.msra.mxu0 %v6054_v41 }
 0x8bc   :  { %4135 = vmatpush3.msra.mxu1 %v6053_v62  ;;  %3780 = vmatprep.subr.bf16.mxu0 %v6055_v44 }
 0x8bd   :  { %4136 = vmatprep.subr.mxu1 %v6056_v8 }
 0x8be   :  { %4137 = vmatpush3.msra.mxu1 %v6056_v8 }
 0x8bf   :  { %4138 = vmatprep.subr.mxu1 %v6057_v51  ;;  %3781 = vmatpush3.bf16.msra.mxu0 %v6058_v28 }
 0x8c0   :  { %4139 = vmatpush3.msra.mxu1 %v6057_v51  ;;  %3782 = vmatprep.subr.bf16.mxu0 %v6059_v6 }
 0x8c1   :  { %4140 = vmatprep.subr.mxu1 %v6060_v7 }
 0x8c2   :  { %4141 = vmatpush3.msra.mxu1 %v6060_v7 }
 0x8c3   :  { %4142 = vmatprep.subr.mxu1 %v6061_v9  ;;  %3783 = vmatpush3.bf16.msra.mxu0 %v6062_v10 }
 0x8c4   :  { %4143 = vmatpush3.msra.mxu1 %v6061_v9  ;;  %3784 = vmatprep.subr.bf16.mxu0 %v6063_v11 }
 0x8c5   :  { %4144 = vmatprep.subr.mxu1 %v6064_v12 }
 0x8c6   :  { %4145 = vmatpush3.msra.mxu1 %v6064_v12 }
 0x8c7   :  { %4146 = vmatprep.subr.mxu1 %v6065_v13  ;;  %3785 = vmatpush3.bf16.msra.mxu0 %v6066_v14  ;;  %v6082_v14 = vld [vmem:[#allocation57_spill] sm:$0xff] }
 0x8c8   :  { %4147 = vmatpush3.msra.mxu1 %v6065_v13  ;;  %3786 = vmatprep.subr.bf16.mxu0 %v6067_v15  ;;  %v6083_v15 = vld [vmem:[#allocation58_spill] sm:$0xff] }
 0x8c9   :  { %4148 = vmatprep.subr.mxu1 %v6068_v17 }
 0x8ca   :  { %4149 = vmatpush3.msra.mxu1 %v6068_v17  ;;  %v6084_v17 = vld [vmem:[#allocation59_spill] sm:$0xff] }
 0x8cb   :  { %4150 = vmatprep.subr.mxu1 %v6069_v18  ;;  %3787 = vmatpush3.bf16.msra.mxu0 %v6070_v19  ;;  %v6086_v19 = vld [vmem:[#allocation61_spill] sm:$0xff] }
 0x8cc   :  { %4151 = vmatpush3.msra.mxu1 %v6069_v18  ;;  %3803 = vmatprep.subr.bf16.mxu0 %v6071_v20  ;;  %v6085_v18 = vld [vmem:[#allocation60_spill] sm:$0xff]  ;;  %v6087_v20 = vld [vmem:[#allocation62_spill] sm:$0xff] }
 0x8cd   :  { %4153 = vmatmul.mubr.f32.vlgmr.msra.gmra.mxu1 %v5503_v5  ;;  %4155 = vmatprep.subr.bf16.mxu1 %v5948_v22  ;;  %v6076_v5 = vld [vmem:[#allocation44_spill] sm:$0xff] }
 0x8ce   :  { %4156 = vmatpush3.bf16.msra.mxu1 %v6072_v38  ;;  %4171 = vmatprep.mubr.msk.bf16.mxu1 %vm4462_vm0, %v5948_v22  ;;  %v6088_v38 = vld [vmem:[#allocation63_spill] sm:$0xff] }
 0x8cf   :  { %4157 = vmatprep.subr.bf16.mxu1 %v5948_v22 }
 0x8d2   :  { %4158 = vmatpush3.bf16.msra.mxu1 %v6073_v30  ;;  %v6089_v30 = vld [vmem:[#allocation64_spill] sm:$0xff] }
 0x8d3   :  { %4159 = vmatprep.subr.bf16.mxu1 %v5948_v22 }
 0x8d6   :  { %4160 = vmatpush3.bf16.msra.mxu1 %v6074_v4  ;;  %v6090_v4 = vld [vmem:[#allocation65_spill] sm:$0xff] }
 0x8d7   :  { %4161 = vmatprep.subr.bf16.mxu1 %v5948_v22 }
 0x8da   :  { %4162 = vmatpush3.bf16.msra.mxu1 %v6075_v40  ;;  %v6091_v40 = vld [vmem:[#allocation66_spill] sm:$0xff] }
 0x8db   :  { %4163 = vmatprep.subr.bf16.mxu1 %v5948_v22 }
 0x8de   :  { %4164 = vmatpush3.bf16.msra.mxu1 %v6076_v5  ;;  %v6092_v5 = vld [vmem:[#allocation67_spill] sm:$0xff] }
 0x8df   :  { %4165 = vmatprep.subr.bf16.mxu1 %v5948_v22 }
 0x8e2   :  { %4166 = vmatpush3.bf16.msra.mxu1 %v6077_v48  ;;  %v6093_v48 = vld [vmem:[#allocation68_spill] sm:$0xff] }
 0x8e3   :  { %4167 = vmatprep.subr.bf16.mxu1 %v5948_v22 }
 0x8e6   :  { %4168 = vmatpush3.bf16.msra.mxu1 %v6078_v56  ;;  %v6094_v56 = vld [vmem:[#allocation69_spill] sm:$0xff] }
 0x8e7   :  { %4169 = vmatprep.subr.bf16.mxu1 %v5948_v22 }
 0x8ea   :  { %4170 = vmatpush3.bf16.msra.mxu1 %v6079_v55  ;;  %v6095_v55 = vld [vmem:[#allocation70_spill] sm:$0xff] }
 0x8eb   :  { %4175 = vmatprep.subr.bf16.mxu1 %v5948_v22 }
 0x96d   :  { %v3739_v52 = vpop.f32.mrf.mxu1  ;;  %v2640_v53 = vpop.f32.mrf.mxu0 }
 0x96f   :  { %v4118_v57 = vpop.f32.mrf.mxu0  ;;  %v3740_v58 = vpop.f32.mrf.mxu1 }
 0x970   :  { %v3741_v24 = vadd.f32 %v3740_v58, %v3739_v52  ;;  %v6096_v52 = vld [vmem:[#allocation71_spill] sm:$0xff]  ;;  %v6098_v57 = vld [vmem:[#allocation73_spill] sm:$0xff]  ;;  %v6099_v58 = vld [vmem:[#allocation74_spill] sm:$0xff] }
 0x971   :  { %v2643_v59 = vpop.f32.mrf.mxu0  ;;  %v3742_v61 = vpop.f32.mrf.mxu1 }
 0x972   :  { %v2641_v25 = vadd.f32 %v3741_v24, %v2640_v53  ;;  %v6097_v53 = vld [vmem:[#allocation72_spill] sm:$0xff] }
 0x973   :  { %v4119_v60 = vpop.f32.mrf.mxu0  ;;  %v3743_v63 = vpop.f32.mrf.mxu1 }
 0x974   :  { %v3744_v31 = vadd.f32 %v3743_v63, %v3742_v61  ;;  %v2647_v35 = vmul.f32 %v5309_v16, %v2641_v25  ;;  %v6101_v60 = vld [vmem:[#allocation76_spill] sm:$0xff]  ;;  %v6102_v61 = vld [vmem:[#allocation77_spill] sm:$0xff]  ;;  %v6103_v63 = vld [vmem:[#allocation78_spill] sm:$0xff] }
 0x976   :  { %v2644_v32 = vadd.f32 %v3744_v31, %v2643_v59  ;;  %v2649_v36 = vadd.f32 %v6081_v34, %v2647_v35  ;;  %v6100_v59 = vld [vmem:[#allocation75_spill] sm:$0xff] }
 0x977   :  { %v6104_v31 = vld [vmem:[#allocation79_spill] sm:$0xff] }
 0x978   :  { %v2648_v26 = vmul.f32 %v5298_v1, %v2644_v32  ;;  %v2653_v46 = vmul.f32 0.1, %v2649_v36  ;;  %vm2651_vm9 = vcmp.ge.f32.partialorder %v2649_v36, 0.0 }
 0x97a   :  { %v2650_v27 = vadd.f32 %v6080_v42, %v2648_v26  ;;  %v2655_v45 = vsel %vm2651_vm9, %v2649_v36, %v2653_v46 }
 0x97c   :  { %v2654_v37 = vmul.f32 0.1, %v2650_v27  ;;  %vm2652_vm8 = vcmp.ge.f32.partialorder %v2650_v27, 0.0 }
 0x97e   :  { %v2656_v23 = vsel %vm2652_vm8, %v2650_v27, %v2654_v37 }
 0x98d   :  { %v4154_v3 = vpop.f32.mrf.mxu1 }
 0x98e   :  { %v2729_v0 = vadd.f32 %v4154_v3, %v5322_v54 }
 0x98f   :  { %v2723_v2 = vpop.f32.mrf.mxu1 }
 0x990   :  { %v2733_v50 = vadd.f32 %v2729_v0, %v2656_v23  ;;  %v2724_v29 = vadd.f32 %v5327_v47, %v2723_v2  ;;  %v6105_v0 = vld [vmem:[#allocation80_spill] sm:$0xff] }
 0x992   :  { %vm2735_vm10 = vcmp.ge.f32.partialorder %v2733_v50, 0.0  ;;  %v2737_v49 = vmul.f32 0.1, %v2733_v50  ;;  %v2732_v62 = vadd.f32 %v2724_v29, %v2655_v45 }
 0x994   :  { %v5639_v41 = vsel %vm2735_vm10, %v2733_v50, %v2737_v49  ;;  %vm2734_vm11 = vcmp.ge.f32.partialorder %v2732_v62, 0.0  ;;  %v2736_v44 = vmul.f32 0.1, %v2732_v62 }
 0x995   :  { %v2741_v8 = vrot.slane %v5639_v41, 7  ;;  %v2745_v54 = vrot.slane %v5639_v41, 1 }
 0x996   :  { %v5642_v51 = vsel %vm2734_vm11, %v2732_v62, %v2736_v44 }
 0x997   :  { %v2740_v28 = vrot.slane %v5642_v51, 7  ;;  %v2744_v6 = vrot.slane %v5642_v51, 1  ;;  %v2749_v47 = vpack.c.bf16 %v5639_v41, %v5642_v51 }
 0x999   :  { %2783 = vmatprep.mubr.bf16.mxu0 %v2749_v47  ;;  %v2742_v7 = vsel %vm58_vm2, %v2740_v28, %v2741_v8  ;;  %v2743_v9 = vsel %vm58_vm2, %v2741_v8, %v2740_v28  ;;  %v2746_v10 = vsel %vm63_vm1, %v2744_v6, %v2745_v54  ;;  %v2747_v11 = vsel %vm63_vm1, %v2745_v54, %v2744_v6 }
 0x99a   :  { %v2748_v12 = vpack.c.bf16 %v2742_v7, %v2743_v9  ;;  %v2750_v13 = vpack.c.bf16 %v2747_v11, %v2746_v10 }
 0x99c   :  { %2784 = vmatmul.mubr.bf16.vlgmr.msra.gmra.mxu0 %v2748_v12  ;;  %4172 = vmatmul.mubr.bf16.vlgmr.msra.gmra.mxu1 %v2750_v13  ;;  %v3038_v12 = vld [vmem:[%s5839_s6 + $0x78] sm:$0xff]  ;;  %v3037_v13 = vld [vmem:[%s5839_s6 + $0x70] sm:$0xff] }
 0x99d   :  { %3804 = vmatpush3.bf16.msra.mxu0 %v6082_v14  ;;  %4176 = vmatpush3.bf16.msra.mxu1 %v6083_v15  ;;  %v3035_v14 = vld [vmem:[%s5839_s6 + $0x60] sm:$0xff]  ;;  %v3034_v15 = vld [vmem:[%s5839_s6 + $0x58] sm:$0xff] }
 0x99e   :  { %3805 = vmatprep.subr.bf16.mxu0 %v6084_v17  ;;  %4177 = vmatprep.subr.bf16.mxu1 %v5948_v22  ;;  %v3033_v17 = vld [vmem:[%s5839_s6 + $0x50] sm:$0xff] }
 0x99f   :  { %4191 = vmatprep.mubr.msk.bf16.mxu1 %vm4462_vm0, %v5948_v22 }
 0x9a1   :  { %3806 = vmatpush3.bf16.msra.mxu0 %v6085_v18  ;;  %4178 = vmatpush3.bf16.msra.mxu1 %v6086_v19  ;;  %v3032_v18 = vld [vmem:[%s5839_s6 + $0x48] sm:$0xff]  ;;  %v3031_v19 = vld [vmem:[%s5839_s6 + $0x40] sm:$0xff] }
 0x9a2   :  { %3807 = vmatprep.subr.bf16.mxu0 %v6087_v20  ;;  %4179 = vmatprep.subr.bf16.mxu1 %v5948_v22  ;;  %v3030_v20 = vld [vmem:[%s5839_s6 + $0x38] sm:$0xff] }
 0x9a5   :  { %3808 = vmatpush3.bf16.msra.mxu0 %v6088_v38  ;;  %4180 = vmatpush3.bf16.msra.mxu1 %v6089_v30  ;;  %v3029_v38 = vld [vmem:[%s5839_s6 + $0x30] sm:$0xff]  ;;  %v3028_v30 = vld [vmem:[%s5839_s6 + $0x28] sm:$0xff] }
 0x9a6   :  { %3809 = vmatprep.subr.bf16.mxu0 %v6090_v4  ;;  %4181 = vmatprep.subr.bf16.mxu1 %v5948_v22  ;;  %v3027_v4 = vld [vmem:[%s5839_s6 + $0x20] sm:$0xff] }
 0x9a9   :  { %3810 = vmatpush3.bf16.msra.mxu0 %v6091_v40  ;;  %4182 = vmatpush3.bf16.msra.mxu1 %v6092_v5  ;;  %v3026_v40 = vld [vmem:[%s5839_s6 + $0x18] sm:$0xff]  ;;  %v3025_v5 = vld [vmem:[%s5839_s6 + $0x10] sm:$0xff] }
 0x9aa   :  { %3811 = vmatprep.subr.bf16.mxu0 %v6093_v48  ;;  %4183 = vmatprep.subr.bf16.mxu1 %v5948_v22  ;;  %v3024_v48 = vld [vmem:[%s5839_s6 + $0x8] sm:$0xff] }
 0x9ad   :  { %3812 = vmatpush3.bf16.msra.mxu0 %v6094_v56  ;;  %4184 = vmatpush3.bf16.msra.mxu1 %v6095_v55 }
 0x9ae   :  { %3813 = vmatprep.subr.bf16.mxu0 %v6096_v52  ;;  %4185 = vmatprep.subr.bf16.mxu1 %v5948_v22 }
 0x9b1   :  { %3814 = vmatpush3.bf16.msra.mxu0 %v6097_v53  ;;  %4186 = vmatpush3.bf16.msra.mxu1 %v6098_v57 }
 0x9b2   :  { %3815 = vmatprep.subr.bf16.mxu0 %v6099_v58  ;;  %4187 = vmatprep.subr.bf16.mxu1 %v5948_v22 }
 0x9b5   :  { %3816 = vmatpush3.bf16.msra.mxu0 %v6100_v59  ;;  %4188 = vmatpush3.bf16.msra.mxu1 %v6101_v60 }
 0x9b6   :  { %3817 = vmatprep.subr.bf16.mxu0 %v6102_v61  ;;  %4189 = vmatprep.subr.bf16.mxu1 %v5948_v22 }
 0x9b9   :  { %3818 = vmatpush3.bf16.msra.mxu0 %v6103_v63  ;;  %4190 = vmatpush3.bf16.msra.mxu1 %v6104_v31 }
 0x9ba   :  { %4195 = vmatprep.subr.mxu0 %v5948_v22  ;;  %4202 = vmatprep.subr.mxu1 %v5948_v22 }
 0xa5c   :  { %v3788_v24 = vpop.f32.mrf.mxu0  ;;  %v2826_v32 = vpop.f32.mrf.mxu1 }
 0xa5e   :  { %v3789_v25 = vpop.f32.mrf.mxu0  ;;  %v4173_v26 = vpop.f32.mrf.mxu1 }
 0xa5f   :  { %v3790_v35 = vadd.f32 %v3789_v25, %v3788_v24  ;;  %v4435_v26 = vld [vmem:[%s5837_s4 + $0x8] sm:$0xff] }
 0xa60   :  { %v3791_v42 = vpop.f32.mrf.mxu0  ;;  %v2829_v27 = vpop.f32.mrf.mxu1 }
 0xa61   :  { %v2827_v34 = vadd.f32 %v3790_v35, %v2826_v32 }
 0xa62   :  { %v3792_v36 = vpop.f32.mrf.mxu0  ;;  %v4174_v37 = vpop.f32.mrf.mxu1 }
 0xa63   :  { %v2833_v3 = vmul.f32 %v5309_v16, %v2827_v34  ;;  %v3793_v46 = vadd.f32 %v3792_v36, %v3791_v42 }
 0xa65   :  { %v2835_v23 = vadd.f32 %v6105_v0, %v2833_v3  ;;  %v2830_v2 = vadd.f32 %v3793_v46, %v2829_v27 }
 0xa67   :  { %v2834_v50 = vmul.f32 %v5298_v1, %v2830_v2  ;;  %vm2837_vm12 = vcmp.ge.f32.partialorder %v2835_v23, 0.0  ;;  %v2839_v29 = vmul.f32 0.1, %v2835_v23  ;;  %v3125_v2 = vld [vmem:[%s5841_s8 + $0x30] sm:$0xff] }
 0xa69   :  { %v2836_v45 = vadd.f32 %v5439_v43, %v2834_v50  ;;  %v2841_v49 = vsel %vm2837_vm12, %v2835_v23, %v2839_v29  ;;  %v3126_v23 = vld [vmem:[%s5841_s8 + $0x38] sm:$0xff]  ;;  %v3124_v50 = vld [vmem:[%s5841_s8 + $0x28] sm:$0xff]  ;;  %v3123_v29 = vld [vmem:[%s5841_s8 + $0x20] sm:$0xff] }
 0xa6a   :  { %v2843_v8 = vrot.slane %v2841_v49, 7  ;;  %v2847_v28 = vrot.slane %v2841_v49, 1 }
 0xa6b   :  { %vm2838_vm13 = vcmp.ge.f32.partialorder %v2836_v45, 0.0  ;;  %v2840_v62 = vmul.f32 0.1, %v2836_v45 }
 0xa6d   :  { %v2842_v44 = vsel %vm2838_vm13, %v2836_v45, %v2840_v62  ;;  %v3122_v45 = vld [vmem:[%s5841_s8 + $0x18] sm:$0xff]  ;;  %v3120_v62 = vld [vmem:[%s5841_s8 + $0x8] sm:$0xff] }
 0xa6e   :  { %v2844_v54 = vrot.slane %v2842_v44, 7  ;;  %v2848_v6 = vrot.slane %v2842_v44, 1  ;;  %v2852_v47 = vpack.c.bf16 %v2842_v44, %v2841_v49  ;;  %v3121_v49 = vld [vmem:[%s5841_s8 + $0x10] sm:$0xff]  ;;  %v3119_v44 = vld [vmem:[%s5841_s8] sm:$0xff] }
 0xa70   :  { %2886 = vmatprep.mubr.bf16.mxu0 %v2852_v47  ;;  %v2845_v7 = vsel %vm58_vm2, %v2843_v8, %v2844_v54  ;;  %v2846_v1 = vsel %vm58_vm2, %v2844_v54, %v2843_v8  ;;  %v2849_v9 = vsel %vm63_vm1, %v2847_v28, %v2848_v6  ;;  %v2850_v43 = vsel %vm63_vm1, %v2848_v6, %v2847_v28  ;;  %v3109_v8 = vld [vmem:[%s5840_s7] sm:$0xf] }
 0xa71   :  { %v2851_v10 = vpack.c.bf16 %v2845_v7, %v2846_v1  ;;  %v2853_v11 = vpack.c.bf16 %v2850_v43, %v2849_v9 }
 0xa73   :  { %2887 = vmatmul.mubr.bf16.vlgmr.msra.gmra.mxu0 %v2851_v10  ;;  %4192 = vmatmul.mubr.bf16.vlgmr.msra.gmra.mxu1 %v2853_v11  ;;  %v3129_v11 = vld [vmem:[%s5842_s9] sm:$0x1] }
 0xa74   :  { %4199 = vmatprep.mubr.msk.f32.mxu0 %vm4462_vm0, %v5948_v22  ;;  %4234 = vmatprep.mubr.msk.f32.mxu1 %vm4462_vm0, %v5948_v22 }
 0xa75   :  { %4203 = vmatpush3.msra.mxu1 %v3038_v12 }
 0xa76   :  { %4204 = vmatprep.subr.mxu1 %v5948_v22 }
 0xa77   :  { %4205 = vmatpush3.msra.mxu1 %v3037_v13 }
 0xa78   :  { %4206 = vmatprep.subr.mxu1 %v5948_v22 }
 0xa79   :  { %4207 = vmatpush3.msra.mxu1 %v3036_v21 }
 0xa7a   :  { %4208 = vmatprep.subr.mxu1 %v5948_v22 }
 0xa7b   :  { %4209 = vmatpush3.msra.mxu1 %v3035_v14 }
 0xa7c   :  { %4210 = vmatprep.subr.mxu1 %v5948_v22 }
 0xa7d   :  { %4211 = vmatpush3.msra.mxu1 %v3034_v15 }
 0xa7e   :  { %4212 = vmatprep.subr.mxu1 %v5948_v22 }
 0xa7f   :  { %4213 = vmatpush3.msra.mxu1 %v3033_v17 }
 0xa80   :  { %4214 = vmatprep.subr.mxu1 %v5948_v22 }
 0xa81   :  { %4215 = vmatpush3.msra.mxu1 %v3032_v18 }
 0xa82   :  { %4216 = vmatprep.subr.mxu1 %v5948_v22 }
 0xa83   :  { %4217 = vmatpush3.msra.mxu1 %v3031_v19 }
 0xa84   :  { %4218 = vmatprep.subr.mxu1 %v5948_v22 }
 0xa85   :  { %4219 = vmatpush3.msra.mxu1 %v3030_v20 }
 0xa86   :  { %4220 = vmatprep.subr.mxu1 %v5948_v22 }
 0xa87   :  { %4221 = vmatpush3.msra.mxu1 %v3029_v38 }
 0xa88   :  { %4222 = vmatprep.subr.mxu1 %v5948_v22 }
 0xa89   :  { %4223 = vmatpush3.msra.mxu1 %v3028_v30 }
 0xa8a   :  { %4224 = vmatprep.subr.mxu1 %v5948_v22 }
 0xa8b   :  { %4225 = vmatpush3.msra.mxu1 %v3027_v4 }
 0xa8c   :  { %4226 = vmatprep.subr.mxu1 %v5948_v22 }
 0xa8d   :  { %4227 = vmatpush3.msra.mxu1 %v3026_v40 }
 0xa8e   :  { %4228 = vmatprep.subr.mxu1 %v5948_v22 }
 0xa8f   :  { %4229 = vmatpush3.msra.mxu1 %v3025_v5 }
 0xa90   :  { %4230 = vmatprep.subr.mxu1 %v5948_v22 }
 0xa91   :  { %4231 = vmatpush3.msra.mxu1 %v3024_v48 }
 0xa92   :  { %4232 = vmatprep.subr.mxu1 %v5948_v22 }
 0xb33   :  { %v3819_v56 = vpop.f32.mrf.mxu0  ;;  %v2929_v55 = vpop.f32.mrf.mxu1 }
 0xb35   :  { %v3820_v52 = vpop.f32.mrf.mxu0  ;;  %v4193_v53 = vpop.f32.mrf.mxu1 }
 0xb36   :  { %v3821_v57 = vadd.f32 %v3820_v52, %v3819_v56 }
 0xb37   :  { %v3822_v58 = vpop.f32.mrf.mxu0  ;;  %v2932_v59 = vpop.f32.mrf.mxu1 }
 0xb38   :  { %v2930_v60 = vadd.f32 %v3821_v57, %v2929_v55 }
 0xb39   :  { %v3823_v61 = vpop.f32.mrf.mxu0  ;;  %v4194_v63 = vpop.f32.mrf.mxu1 }
 0xb3a   :  { %v2936_v31 = vmul.f32 %v5309_v16, %v2930_v60  ;;  %v3824_v24 = vadd.f32 %v3823_v61, %v3822_v58 }
 0xb3c   :  { %v2938_v32 = vadd.f32 %v5488_v39, %v2936_v31  ;;  %v2933_v25 = vadd.f32 %v3824_v24, %v2932_v59  ;;  %v2948_v39 = vld [vmem:[%s5838_s5] sm:$0xf] }
 0xb3e   :  { %v2937_v35 = vmul.f32 %v4435_v26, %v2933_v25  ;;  %v2940_v27 = vadd.f32 %v2938_v32, %v5642_v51  ;;  %v3127_v51 = vld [vmem:[%s5841_s8 + $0x40] sm:$0xff] }
 0xb40   :  { %v2939_v42 = vadd.f32 %v5495_v33, %v2937_v35  ;;  %v2944_v37 = vmul.f32 0.1, %v2940_v27  ;;  %vm2942_vm2 = vcmp.ge.f32.partialorder %v2940_v27, 0.0  ;;  %v3023_v33 = vld [vmem:[%s5839_s6] sm:$0xff] }
 0xb41   :  { %4233 = vmatpush3.msra.mxu1 %v3023_v33 }
 0xb42   :  { %v2941_v34 = vadd.f32 %v2939_v42, %v5639_v41  ;;  %v2946_v3 = vsel %vm2942_vm2, %v2940_v27, %v2944_v37  ;;  %v3128_v41 = vld [vmem:[%s5841_s8 + $0x48] sm:$0xff] }
 0xb44   :  { %vm2943_vm1 = vcmp.ge.f32.partialorder %v2941_v34, 0.0  ;;  %v2945_v36 = vmul.f32 0.1, %v2941_v34 }
 0xb46   :  { %v2947_v16 = vsel %vm2943_vm1, %v2941_v34, %v2945_v36 }
 0xb47   :  { %4196 = vmatpush3.msra.mxu0 %v2947_v16 }
 0xb48   :  { %4197 = vmatprep.subr.mxu0 %v5948_v22 }
 0xb49   :  { %4198 = vmatpush3.msra.mxu0 %v2946_v3 }
 0xb4a   :  { %4200 = vmatmul.mubr.msk.f32.vlgmr.msra.gmra.mxu0 %vm2949_vm14, %v2948_v39  ;;  %4237 = vmatprep.subr.mxu0 %v5948_v22 }
 0xb4b   :  { %4257 = vmatprep.mubr.msk.f32.mxu0 %vm4462_vm0, %v5948_v22  ;;  %4238 = vmatpush3.msra.mxu0 %v3128_v41  ;;  %vm3111_vm0 = vcmask 650240  }
 0xb4c   :  { %4239 = vmatprep.subr.mxu0 %v5948_v22 }
 0xb4d   :  { %4240 = vmatpush3.msra.mxu0 %v3127_v51 }
 0xb4e   :  { %4241 = vmatprep.subr.mxu0 %v5948_v22 }
 0xb4f   :  { %4242 = vmatpush3.msra.mxu0 %v3126_v23 }
 0xb50   :  { %4243 = vmatprep.subr.mxu0 %v5948_v22 }
 0xb51   :  { %4244 = vmatpush3.msra.mxu0 %v3125_v2 }
 0xb52   :  { %4245 = vmatprep.subr.mxu0 %v5948_v22 }
 0xb53   :  { %4246 = vmatpush3.msra.mxu0 %v3124_v50 }
 0xb54   :  { %4247 = vmatprep.subr.mxu0 %v5948_v22 }
 0xb55   :  { %4248 = vmatpush3.msra.mxu0 %v3123_v29 }
 0xb56   :  { %4249 = vmatprep.subr.mxu0 %v5948_v22 }
 0xb57   :  { %4250 = vmatpush3.msra.mxu0 %v3122_v45 }
 0xb58   :  { %4251 = vmatprep.subr.mxu0 %v5948_v22 }
 0xb59   :  { %4252 = vmatpush3.msra.mxu0 %v3121_v49 }
 0xb5a   :  { %4253 = vmatprep.subr.mxu0 %v5948_v22 }
 0xb5b   :  { %4254 = vmatpush3.msra.mxu0 %v3120_v62 }
 0xb5c   :  { %4255 = vmatprep.subr.mxu0 %v5948_v22 }
 0xb5d   :  { %4256 = vmatpush3.msra.mxu0 %v3119_v44 }
 0xc0a   :  { %v3019_v46 = vpop.f32.mrf.mxu0 }
 0xc0b   :  { %4235 = vmatmul.mubr.f32.vlgmr.msra.gmra.mxu1 %v3019_v46 }
 0xc0c   :  { %v4201_v0 = vpop.f32.mrf.mxu0 }
 0xccb   :  { %v3105_v54 = vpop.f32.mrf.mxu1 }
 0xccc   :  { %v3110_v28 = vmul.f32 %v3109_v8, %v3105_v54 }
 0xccd   :  { %v4236_v6 = vpop.f32.mrf.mxu1 }
 0xcce   :  { %v3112_v47 = vsel %vm3111_vm0, %v3110_v28, 0.0 }
 0xccf   :  { %v3113_v7 = vrot.slane %v3112_v47, 4 }
 0xcd1   :  { %v3114_v1 = vadd.f32 %v3113_v7, %v3112_v47 }
 0xcd3   :  { %v3115_v9 = vrot.slane %v3114_v1, 2 }
 0xcd5   :  { %v3116_v43 = vadd.f32 %v3115_v9, %v3114_v1 }
 0xcd7   :  { %v3117_v10 = vrot.slane %v3116_v43, 1 }
 0xcd9   :  { %v3118_v22 = vadd.f32 %v3117_v10, %v3116_v43 }
 0xcdb   :  { %4258 = vmatmul.mubr.msk.f32.vlgmr.msra.gmra.mxu0 %vm3130_vm15, %v3118_v22 }
 0xd9b   :  { %v3200_v12 = vpop.f32.mrf.mxu0 }
 0xd9c   :  { %v3201_v13 = vadd.f32 %v3200_v12, %v3129_v11 }
 0xd9d   :  { %v4259_v21 = vpop.f32.mrf.mxu0 }
 0xd9e   :  { %3205 = vst.msk [vmem:[%s5843_s10] sm:$0x1] %vm3204_vm3, %v3201_v13 }
 0xd9f   :  { %3210 = vsyncpa [#allocation3], 1 }

</bundles_post_ra>
